<compile_context>
chip_gen: v5e
topology: v5e:2x2
jax: 0.10.0
libtpu: 0.0.40
codegen_flags: <defaults>
</compile_context>

<pallas_src>
import functools

import jax
import jax.numpy as jnp
from jax.experimental import pallas as pl
from jax.experimental.pallas import tpu as pltpu

LANE = 128          # lane width every narrow dim is padded to
FEAT_PAD = 1024     # classifier feature dim 1000 -> 1024


def _round_up(x, m):
    return (x + m - 1) // m * m


def pet_head_kernel(pooled_ref, wc_ref, bc_ref,
                    w1_ref, b1_ref, w2_ref, b2_ref,
                    w3_ref, b3_ref, w4_ref, b4_ref, o_ref):
    """Fused classifier projection + 4-layer ReLU MLP, entirely in VMEM.

    Weights are bf16 (MXU-native), accumulation is f32, bias add + ReLU in
    f32 (v5e-friendly).  All tiles are lane-dense (last dim multiple of 128).
    """
    h = pooled_ref[...].astype(jnp.bfloat16)                            # (TB, 128)
    # classifier linear (128-padded C -> 1024), no activation
    h = jnp.dot(h, wc_ref[...], preferred_element_type=jnp.float32) + bc_ref[...]
    # fc_layers: Linear(1024->256) + ReLU
    h = jnp.maximum(jnp.dot(h.astype(jnp.bfloat16), w1_ref[...],
                            preferred_element_type=jnp.float32) + b1_ref[...], 0.0)
    # Linear(256->64 padded to 128) + ReLU
    h = jnp.maximum(jnp.dot(h.astype(jnp.bfloat16), w2_ref[...],
                            preferred_element_type=jnp.float32) + b2_ref[...], 0.0)
    # Linear(64->16, 128-padded) + ReLU
    h = jnp.maximum(jnp.dot(h.astype(jnp.bfloat16), w3_ref[...],
                            preferred_element_type=jnp.float32) + b3_ref[...], 0.0)
    # Linear(16->2, 128-padded) + ReLU
    h = jnp.maximum(jnp.dot(h.astype(jnp.bfloat16), w4_ref[...],
                            preferred_element_type=jnp.float32) + b4_ref[...], 0.0)
    o_ref[...] = h.astype(o_ref.dtype)                                  # (TB, 128)


@functools.partial(jax.jit, static_argnames=("tb",))
def pet_forward(X, wc, bc, params, *, tb=512):
    """PetModel.forward.

    X: (B, C, H, W) f32.
    wc: (CP, 1024) bf16 (C rows zero-padded to CP=128, 1000 cols padded to 1024)
    bc: (1, 1024) f32 (zero-padded)
    params: 4 tuples (w bf16, b f32), all lane-padded to multiples of 128.
    Returns (B, 2) f32 logits (post-ReLU, as in the PyTorch module).
    """
    B, C, H, W = X.shape
    (w1, b1), (w2, b2), (w3, b3), (w4, b4) = params

    CP = wc.shape[0]        # 128 (lane-padded pooled feature dim)
    Kp = wc.shape[1]        # 1024
    N1 = w1.shape[1]        # 256
    NP = w2.shape[1]        # 128 (padded width of the late layers & output)

    # Classifier's global-average-pool (plain-JAX glue, fused under this jit).
    pooled = jnp.mean(X, axis=(2, 3))                                   # (B, C) f32

    # Batch tiling: big tiles to amortize per-step overhead, but guarantee
    # >= 2 grid steps when the batch is large enough to split (v7x megacore).
    TB = min(tb, _round_up(B, 8))
    if _round_up(B, TB) // TB < 2 and TB >= 16:
        TB = _round_up(TB // 2, 8)
    Bp = _round_up(B, TB)

    # Zero-pad rows to Bp and feature columns C -> CP (lane-dense input tile).
    pooled = jnp.pad(pooled, ((0, Bp - B), (0, CP - C)))

    def weight_spec(shape):
        # Same block every grid step -> stays VMEM-resident (no re-DMA).
        return pl.BlockSpec(shape, lambda i: (0, 0))

    out = pl.pallas_call(
        pet_head_kernel,
        out_shape=jax.ShapeDtypeStruct((Bp, NP), jnp.float32),
        grid=(Bp // TB,),
        in_specs=[
            pl.BlockSpec((TB, CP), lambda i: (i, 0)),        # pooled (pipelined)
            weight_spec((CP, Kp)), weight_spec((1, Kp)),     # wc, bc
            weight_spec((Kp, N1)), weight_spec((1, N1)),     # w1, b1
            weight_spec((N1, NP)), weight_spec((1, NP)),     # w2, b2
            weight_spec((NP, NP)), weight_spec((1, NP)),     # w3, b3
            weight_spec((NP, NP)), weight_spec((1, NP)),     # w4, b4
        ],
        out_specs=pl.BlockSpec((TB, NP), lambda i: (i, 0)),
        compiler_params=pltpu.CompilerParams(
            dimension_semantics=("parallel",)),
    )(pooled, wc, bc, w1, b1, w2, b2, w3, b3, w4, b4)

    return out[:B, :2]


def init_linear(key, fan_in, fan_out):
    """Deterministic init mimicking nn.Linear's default U(-1/sqrt(fan_in), ...)."""
    kw, kb = jax.random.split(key)
    bound = 1.0 / (fan_in ** 0.5)
    w = jax.random.uniform(kw, (fan_in, fan_out), jnp.float32, -bound, bound)
    b = jax.random.uniform(kb, (1, fan_out), jnp.float32, -bound, bound)
    return w, b


def _pad_wb(w, b, k_pad, n_pad):
    """Zero-pad a Linear's weight to (k_pad, n_pad) bf16 and bias to (1, n_pad) f32."""
    k, n = w.shape
    wp = jnp.pad(w, ((0, k_pad - k), (0, n_pad - n))).astype(jnp.bfloat16)
    bp = jnp.pad(b, ((0, 0), (0, n_pad - n)))
    return wp, bp


def prep_params(wc_f32, bc_f32, fc_f32):
    """Lane-pad all parameters: exact math (zero cols -> ReLU(0)=0 -> zero K rows)."""
    C = wc_f32.shape[0]
    wc, bc = _pad_wb(wc_f32, bc_f32, _round_up(C, LANE), FEAT_PAD)          # (128,1024)
    (w1, b1), (w2, b2), (w3, b3), (w4, b4) = fc_f32
    w1p, b1p = _pad_wb(w1, b1, FEAT_PAD, _round_up(w1.shape[1], LANE))      # (1024,256)
    w2p, b2p = _pad_wb(w2, b2, _round_up(w2.shape[0], LANE), LANE)          # (256,128)
    w3p, b3p = _pad_wb(w3, b3, LANE, LANE)                                  # (128,128)
    w4p, b4p = _pad_wb(w4, b4, LANE, LANE)                                  # (128,128)
    return wc, bc, ((w1p, b1p), (w2p, b2p), (w3p, b3p), (w4p, b4p))


if __name__ == "__main__":
    key = jax.random.PRNGKey(0)
    kx, kc, k1, k2, k3, k4 = jax.random.split(key, 6)

    # Small NCHW image batch (PyTorch convention).
    B, C, H, W = 2, 4, 16, 16
    X = jax.random.normal(kx, (B, C, H, W), dtype=jnp.float32)

    # Synthetic frozen classifier (external to PetModel): GAP + Linear C->1000.
    wc_f32, bc_f32 = init_linear(kc, C, 1000)

    # PetModel.fc_layers parameters (deterministic, frozen-in-script).
    fc_f32 = (
        init_linear(k1, 1000, 256),
        init_linear(k2, 256, 64),
        init_linear(k3, 64, 16),
        init_linear(k4, 16, 2),
    )

    # Kernel-side parameter prep: lane-pad everything to multiples of 128,
    # bf16 weights, f32 biases.
    wc, bc, params = prep_params(wc_f32, bc_f32, fc_f32)

    out = pet_forward(X, wc, bc, params)
    out = jax.block_until_ready(out)

    # Pure-JAX reference with matching bf16-weight / f32-accumulate semantics.
    pooled = jnp.mean(X, axis=(2, 3))
    ref = jnp.dot(pooled.astype(jnp.bfloat16), wc_f32.astype(jnp.bfloat16),
                  preferred_element_type=jnp.float32) + bc_f32
    for (w, b) in fc_f32:
        ref = jnp.maximum(
            jnp.dot(ref.astype(jnp.bfloat16), w.astype(jnp.bfloat16),
                    preferred_element_type=jnp.float32) + b, 0.0)

    assert out.shape == (B, 2)
    assert jnp.allclose(out, ref, atol=5e-3, rtol=5e-3), "mismatch vs reference"

    print("KERNEL_OK")
</pallas_src>

<mosaic_0001>
module attributes {stable_mosaic.version = 11 : i64} {
  func.func @pet_head_kernel(%arg0: i32, %arg1: memref<8x128xf32, #tpu.memory_space<vmem>>, %arg2: memref<128x1024xbf16, #tpu.memory_space<vmem>>, %arg3: memref<1x1024xf32, #tpu.memory_space<vmem>>, %arg4: memref<1024x256xbf16, #tpu.memory_space<vmem>>, %arg5: memref<1x256xf32, #tpu.memory_space<vmem>>, %arg6: memref<256x128xbf16, #tpu.memory_space<vmem>>, %arg7: memref<1x128xf32, #tpu.memory_space<vmem>>, %arg8: memref<128x128xbf16, #tpu.memory_space<vmem>>, %arg9: memref<1x128xf32, #tpu.memory_space<vmem>>, %arg10: memref<128x128xbf16, #tpu.memory_space<vmem>>, %arg11: memref<1x128xf32, #tpu.memory_space<vmem>>, %arg12: memref<8x128xf32, #tpu.memory_space<vmem>>) attributes {dimension_semantics = [#tpu.dimension_semantics<parallel>], iteration_bounds = array<i64: 1>, scalar_prefetch = 0 : i64, scratch_operands = 0 : i64, tpu.core_type = #tpu.core_type<tc>, window_params = [{transform_indices = @transform_0, window_bounds = array<i64: 8, 128>}, {pipeline_mode = #tpu.pipeline_mode<synchronous>, transform_indices = @transform_1, window_bounds = array<i64: 128, 1024>}, {pipeline_mode = #tpu.pipeline_mode<synchronous>, transform_indices = @transform_2, window_bounds = array<i64: 1, 1024>}, {pipeline_mode = #tpu.pipeline_mode<synchronous>, transform_indices = @transform_3, window_bounds = array<i64: 1024, 256>}, {pipeline_mode = #tpu.pipeline_mode<synchronous>, transform_indices = @transform_4, window_bounds = array<i64: 1, 256>}, {pipeline_mode = #tpu.pipeline_mode<synchronous>, transform_indices = @transform_5, window_bounds = array<i64: 256, 128>}, {pipeline_mode = #tpu.pipeline_mode<synchronous>, transform_indices = @transform_6, window_bounds = array<i64: 1, 128>}, {pipeline_mode = #tpu.pipeline_mode<synchronous>, transform_indices = @transform_7, window_bounds = array<i64: 128, 128>}, {pipeline_mode = #tpu.pipeline_mode<synchronous>, transform_indices = @transform_8, window_bounds = array<i64: 1, 128>}, {pipeline_mode = #tpu.pipeline_mode<synchronous>, transform_indices = @transform_9, window_bounds = array<i64: 128, 128>}, {pipeline_mode = #tpu.pipeline_mode<synchronous>, transform_indices = @transform_10, window_bounds = array<i64: 1, 128>}, {transform_indices = @transform_11, window_bounds = array<i64: 8, 128>}]} {
    %c0 = arith.constant 0 : index
    %c0_0 = arith.constant 0 : index
    %0 = vector.load %arg1[%c0, %c0_0] : memref<8x128xf32, #tpu.memory_space<vmem>>, vector<8x128xf32>
    %1 = arith.truncf %0 : vector<8x128xf32> to vector<8x128xbf16>
    %c0_1 = arith.constant 0 : index
    %c0_2 = arith.constant 0 : index
    %2 = vector.load %arg2[%c0_1, %c0_2] : memref<128x1024xbf16, #tpu.memory_space<vmem>>, vector<128x1024xbf16>
    %cst = arith.constant dense<0.000000e+00> : vector<8x1024xf32>
    %3 = tpu.matmul %1, %2, %cst {dimension_numbers = #tpu.dot_dimension_numbers<[1], [0], [0], [1], [0, 0, 1, 1], [], []>} : vector<8x128xbf16>, vector<128x1024xbf16>, vector<8x1024xf32> -> vector<8x1024xf32>
    %c0_3 = arith.constant 0 : index
    %c0_4 = arith.constant 0 : index
    %4 = vector.load %arg3[%c0_3, %c0_4] : memref<1x1024xf32, #tpu.memory_space<vmem>>, vector<1x1024xf32>
    %5 = vector.broadcast %4 : vector<1x1024xf32> to vector<8x1024xf32>
    %6 = arith.addf %3, %5 : vector<8x1024xf32>
    %7 = arith.truncf %6 : vector<8x1024xf32> to vector<8x1024xbf16>
    %c0_5 = arith.constant 0 : index
    %c0_6 = arith.constant 0 : index
    %8 = vector.load %arg4[%c0_5, %c0_6] : memref<1024x256xbf16, #tpu.memory_space<vmem>>, vector<1024x256xbf16>
    %cst_7 = arith.constant dense<0.000000e+00> : vector<8x256xf32>
    %9 = tpu.matmul %7, %8, %cst_7 {dimension_numbers = #tpu.dot_dimension_numbers<[1], [0], [0], [1], [0, 0, 1, 1], [], []>} : vector<8x1024xbf16>, vector<1024x256xbf16>, vector<8x256xf32> -> vector<8x256xf32>
    %c0_8 = arith.constant 0 : index
    %c0_9 = arith.constant 0 : index
    %10 = vector.load %arg5[%c0_8, %c0_9] : memref<1x256xf32, #tpu.memory_space<vmem>>, vector<1x256xf32>
    %11 = vector.broadcast %10 : vector<1x256xf32> to vector<8x256xf32>
    %12 = arith.addf %9, %11 : vector<8x256xf32>
    %cst_10 = arith.constant 0.000000e+00 : f32
    %13 = vector.broadcast %cst_10 : f32 to vector<8x256xf32>
    %14 = arith.maximumf %12, %13 : vector<8x256xf32>
    %15 = arith.truncf %14 : vector<8x256xf32> to vector<8x256xbf16>
    %c0_11 = arith.constant 0 : index
    %c0_12 = arith.constant 0 : index
    %16 = vector.load %arg6[%c0_11, %c0_12] : memref<256x128xbf16, #tpu.memory_space<vmem>>, vector<256x128xbf16>
    %cst_13 = arith.constant dense<0.000000e+00> : vector<8x128xf32>
    %17 = tpu.matmul %15, %16, %cst_13 {dimension_numbers = #tpu.dot_dimension_numbers<[1], [0], [0], [1], [0, 0, 1, 1], [], []>} : vector<8x256xbf16>, vector<256x128xbf16>, vector<8x128xf32> -> vector<8x128xf32>
    %c0_14 = arith.constant 0 : index
    %c0_15 = arith.constant 0 : index
    %18 = vector.load %arg7[%c0_14, %c0_15] : memref<1x128xf32, #tpu.memory_space<vmem>>, vector<1x128xf32>
    %19 = vector.broadcast %18 : vector<1x128xf32> to vector<8x128xf32>
    %20 = arith.addf %17, %19 : vector<8x128xf32>
    %cst_16 = arith.constant 0.000000e+00 : f32
    %21 = vector.broadcast %cst_16 : f32 to vector<8x128xf32>
    %22 = arith.maximumf %20, %21 : vector<8x128xf32>
    %23 = arith.truncf %22 : vector<8x128xf32> to vector<8x128xbf16>
    %c0_17 = arith.constant 0 : index
    %c0_18 = arith.constant 0 : index
    %24 = vector.load %arg8[%c0_17, %c0_18] : memref<128x128xbf16, #tpu.memory_space<vmem>>, vector<128x128xbf16>
    %cst_19 = arith.constant dense<0.000000e+00> : vector<8x128xf32>
    %25 = tpu.matmul %23, %24, %cst_19 {dimension_numbers = #tpu.dot_dimension_numbers<[1], [0], [0], [1], [0, 0, 1, 1], [], []>} : vector<8x128xbf16>, vector<128x128xbf16>, vector<8x128xf32> -> vector<8x128xf32>
    %c0_20 = arith.constant 0 : index
    %c0_21 = arith.constant 0 : index
    %26 = vector.load %arg9[%c0_20, %c0_21] : memref<1x128xf32, #tpu.memory_space<vmem>>, vector<1x128xf32>
    %27 = vector.broadcast %26 : vector<1x128xf32> to vector<8x128xf32>
    %28 = arith.addf %25, %27 : vector<8x128xf32>
    %cst_22 = arith.constant 0.000000e+00 : f32
    %29 = vector.broadcast %cst_22 : f32 to vector<8x128xf32>
    %30 = arith.maximumf %28, %29 : vector<8x128xf32>
    %31 = arith.truncf %30 : vector<8x128xf32> to vector<8x128xbf16>
    %c0_23 = arith.constant 0 : index
    %c0_24 = arith.constant 0 : index
    %32 = vector.load %arg10[%c0_23, %c0_24] : memref<128x128xbf16, #tpu.memory_space<vmem>>, vector<128x128xbf16>
    %cst_25 = arith.constant dense<0.000000e+00> : vector<8x128xf32>
    %33 = tpu.matmul %31, %32, %cst_25 {dimension_numbers = #tpu.dot_dimension_numbers<[1], [0], [0], [1], [0, 0, 1, 1], [], []>} : vector<8x128xbf16>, vector<128x128xbf16>, vector<8x128xf32> -> vector<8x128xf32>
    %c0_26 = arith.constant 0 : index
    %c0_27 = arith.constant 0 : index
    %34 = vector.load %arg11[%c0_26, %c0_27] : memref<1x128xf32, #tpu.memory_space<vmem>>, vector<1x128xf32>
    %35 = vector.broadcast %34 : vector<1x128xf32> to vector<8x128xf32>
    %36 = arith.addf %33, %35 : vector<8x128xf32>
    %cst_28 = arith.constant 0.000000e+00 : f32
    %37 = vector.broadcast %cst_28 : f32 to vector<8x128xf32>
    %38 = arith.maximumf %36, %37 : vector<8x128xf32>
    %c0_29 = arith.constant 0 : index
    %c0_30 = arith.constant 0 : index
    %39 = vector.load %arg12[%c0_29, %c0_30] : memref<8x128xf32, #tpu.memory_space<vmem>>, vector<8x128xf32>
    tpu.vector_store %arg12[%c0_29, %c0_30], %38 {strides = array<i32>} : memref<8x128xf32, #tpu.memory_space<vmem>>, vector<8x128xf32>,
    return
  }
  func.func @transform_0(%arg0: i32) -> (i32, i32) {
    %c0_i32 = arith.constant 0 : i32
    %c0_i32_0 = arith.constant 0 : i32
    return %arg0, %c0_i32 : i32, i32
  }
  func.func @transform_1(%arg0: i32) -> (i32, i32) {
    %c0_i32 = arith.constant 0 : i32
    %c0_i32_0 = arith.constant 0 : i32
    %c0_i32_1 = arith.constant 0 : i32
    return %c0_i32, %c0_i32_0 : i32, i32
  }
  func.func @transform_2(%arg0: i32) -> (i32, i32) {
    %c0_i32 = arith.constant 0 : i32
    %c0_i32_0 = arith.constant 0 : i32
    %c0_i32_1 = arith.constant 0 : i32
    return %c0_i32, %c0_i32_0 : i32, i32
  }
  func.func @transform_3(%arg0: i32) -> (i32, i32) {
    %c0_i32 = arith.constant 0 : i32
    %c0_i32_0 = arith.constant 0 : i32
    %c0_i32_1 = arith.constant 0 : i32
    return %c0_i32, %c0_i32_0 : i32, i32
  }
  func.func @transform_4(%arg0: i32) -> (i32, i32) {
    %c0_i32 = arith.constant 0 : i32
    %c0_i32_0 = arith.constant 0 : i32
    %c0_i32_1 = arith.constant 0 : i32
    return %c0_i32, %c0_i32_0 : i32, i32
  }
  func.func @transform_5(%arg0: i32) -> (i32, i32) {
    %c0_i32 = arith.constant 0 : i32
    %c0_i32_0 = arith.constant 0 : i32
    %c0_i32_1 = arith.constant 0 : i32
    return %c0_i32, %c0_i32_0 : i32, i32
  }
  func.func @transform_6(%arg0: i32) -> (i32, i32) {
    %c0_i32 = arith.constant 0 : i32
    %c0_i32_0 = arith.constant 0 : i32
    %c0_i32_1 = arith.constant 0 : i32
    return %c0_i32, %c0_i32_0 : i32, i32
  }
  func.func @transform_7(%arg0: i32) -> (i32, i32) {
    %c0_i32 = arith.constant 0 : i32
    %c0_i32_0 = arith.constant 0 : i32
    %c0_i32_1 = arith.constant 0 : i32
    return %c0_i32, %c0_i32_0 : i32, i32
  }
  func.func @transform_8(%arg0: i32) -> (i32, i32) {
    %c0_i32 = arith.constant 0 : i32
    %c0_i32_0 = arith.constant 0 : i32
    %c0_i32_1 = arith.constant 0 : i32
    return %c0_i32, %c0_i32_0 : i32, i32
  }
  func.func @transform_9(%arg0: i32) -> (i32, i32) {
    %c0_i32 = arith.constant 0 : i32
    %c0_i32_0 = arith.constant 0 : i32
    %c0_i32_1 = arith.constant 0 : i32
    return %c0_i32, %c0_i32_0 : i32, i32
  }
  func.func @transform_10(%arg0: i32) -> (i32, i32) {
    %c0_i32 = arith.constant 0 : i32
    %c0_i32_0 = arith.constant 0 : i32
    %c0_i32_1 = arith.constant 0 : i32
    return %c0_i32, %c0_i32_0 : i32, i32
  }
  func.func @transform_11(%arg0: i32) -> (i32, i32) {
    %c0_i32 = arith.constant 0 : i32
    %c0_i32_0 = arith.constant 0 : i32
    return %arg0, %c0_i32 : i32, i32
  }
}

</mosaic_0001>

<bundles_post_ra>
// kernel: pet_forward.1
= control target key start
LH: loop header
LB: loop body
LE: loop exit
PB: predicated region body
PF: predicated region fallthrough
CT: control target
= control target key end

     0   :  { %16 = vsyncpa [#allocation3], 0  ;;  %s3374_s0 = inlined_call_operand.vmem [shape: f32[8,128], index: 0, kind: input, shape index: {}]   ;;  %s3375_s1 = inlined_call_operand.hbm [shape: bf16[128,1024], index: 1, kind: input, shape index: {}]   ;;  %s3376_s2 = inlined_call_operand.vmem [shape: f32[1,1024], index: 2, kind: input, shape index: {}]   ;;  %s3377_s3 = inlined_call_operand.hbm [shape: bf16[1024,256], index: 3, kind: input, shape index: {}]   ;;  %s3378_s4 = inlined_call_operand.vmem [shape: f32[1,256], index: 4, kind: input, shape index: {}]   ;;  %s3379_s5 = inlined_call_operand.vmem [shape: bf16[256,128], index: 5, kind: input, shape index: {}]   ;;  %s3380_s6 = inlined_call_operand.vmem [shape: f32[1,128], index: 6, kind: input, shape index: {}]   ;;  %s3381_s7 = inlined_call_operand.hbm [shape: bf16[128,128], index: 7, kind: input, shape index: {}]   ;;  %s3382_s8 = inlined_call_operand.vmem [shape: f32[1,128], index: 8, kind: input, shape index: {}]   ;;  %s3383_s9 = inlined_call_operand.hbm [shape: bf16[128,128], index: 9, kind: input, shape index: {}]   ;;  %s3384_s10 = inlined_call_operand.vmem [shape: f32[1,128], index: 10, kind: input, shape index: {}]   ;;  %s3385_s11 = inlined_call_operand.vmem [shape: f32[8,128], index: 11, kind: output, shape index: {}]  }
   0x1   :  { %17 = vsyncpa [#allocation5], 0  ;;  %s40_s19 = sshll.u32 %s3377_s3, 4  ;;  %s41_s19 = int_to_ptr.hbm [resolvable:$true] %s40_s19 }
   0x2   :  { %18 = vsyncpa [#allocation8], 0  ;;  %s3171_s20 = smov [#allocation4]   ;;  %s25_s24 = sshll.u32 %s3375_s1, 4  ;;  %s26_s24 = int_to_ptr.hbm [resolvable:$true] %s25_s24 }
   0x3   :  { %s42_s21 = sshll.u32 %s3171_s20, 4  ;;  %s3172_s25 = smov 128   ;;  %s43_s21 = int_to_ptr.vmem [resolvable:$true] %s42_s21 }
   0x4   :  { %s3173_s26 = smov 8   ;;  %s3174_s27 = smov [#allocation2]  }
   0x5   :  { %48 = dma.hbm_to_vmem [thread:$0]  %s41_s19, 16384, %s43_s21, [#allocation5], %s3172_s25, %s3172_s25, %s3173_s26  }
   0x6   :  { %s27_s28 = sshll.u32 %s3174_s27, 4  ;;  %s3175_s29 = smov 512   ;;  %s28_s28 = int_to_ptr.vmem [resolvable:$true] %s27_s28 }
   0x7   :  { %s3176_s30 = smov 32   ;;  %s59_s13 = sshll.u32 %s3381_s7, 4  ;;  %s60_s13 = int_to_ptr.hbm [resolvable:$true] %s59_s13 }
   0x8   :  { %33 = dma.hbm_to_vmem [thread:$0]  %s26_s24, 8192, %s28_s28, [#allocation3], %s3175_s29, %s3175_s29, %s3176_s30  }
   0x9   :  { %s3177_s14 = smov [#allocation6]   ;;  %s74_s17 = sshll.u32 %s3383_s9, 4  ;;  %s75_s17 = int_to_ptr.hbm [resolvable:$true] %s74_s17 }
   0xa   :  { %s61_s15 = sshll.u32 %s3177_s14, 4  ;;  %s3178_s18 = smov 64   ;;  %s62_s15 = int_to_ptr.vmem [resolvable:$true] %s61_s15 }
   0xb   :  { %s3179_s19 = smov 4   ;;  %s3180_s20 = smov [#allocation7]  }
   0xc   :  { %67 = dma.hbm_to_vmem [thread:$0]  %s60_s13, 1024, %s62_s15, [#allocation5], %s3178_s18, %s3178_s18, %s3179_s19  }
   0xd   :  { %s76_s21 = sshll.u32 %s3180_s20, 4  ;;  %s77_s21 = int_to_ptr.vmem [resolvable:$true] %s76_s21 }
   0xe   :  { %82 = dma.hbm_to_vmem [thread:$0]  %s75_s17, 1024, %s77_s21, [#allocation8], %s3178_s18, %s3178_s18, %s3179_s19  }
   0xf   :  { %3165 = dma.done.wait [#allocation3], 8192  }
  0x10   :  { %3166 = vsyncadd [#allocation3], 4294959104 }
  0x11   :  { %3167 = dma.done.wait [#allocation5], 17408  }
  0x12   :  { %3168 = vsyncadd [#allocation5], 4294949888 }
  0x13   :  { %3169 = dma.done.wait [#allocation8], 1024  }
  0x14   :  { %3170 = vsyncadd [#allocation8], 4294966272  ;;  %v2162_v0 = vld [vmem:[#allocation2 + $0x1c0] sm:$0xf]  ;;  %v2888_v2 = vld [vmem:[#allocation2 + $0x1c4] sm:$0xf] }
  0x15   :  { %v2892_v1 = vld [vmem:[#allocation2 + $0x1dc] sm:$0xf0]  ;;  %v2164_v4 = vld [vmem:[#allocation2 + $0x1e0] sm:$0xf0]  ;;  %v2170_v5 = vld [vmem:[#allocation2 + $0x1c8] sm:$0xf] }
  0x16   :  { %v2163_v3 = vor.u32 %v2892_v1, %v2162_v0  ;;  %v2893_v6 = vld [vmem:[#allocation2 + $0x1e4] sm:$0xf0]  ;;  %v2167_v7 = vor.u32 %v2888_v2, %v2164_v4  ;;  %v2889_v9 = vld [vmem:[#allocation2 + $0x1cc] sm:$0xf]  ;;  %v2130_v11 = vld [vmem:[#allocation2 + $0x180] sm:$0xf] }
  0x17   :  { %v2171_v8 = vor.u32 %v2893_v6, %v2170_v5  ;;  %v2172_v10 = vld [vmem:[#allocation2 + $0x1e8] sm:$0xf0]  ;;  %v2884_v13 = vld [vmem:[#allocation2 + $0x19c] sm:$0xf0]  ;;  %v2880_v14 = vld [vmem:[#allocation2 + $0x184] sm:$0xf] }
  0x18   :  { %505 = vmatpush.bf16.msra.mxu0 %v2163_v3  ;;  %v2175_v12 = vor.u32 %v2889_v9, %v2172_v10  ;;  %v2132_v15 = vld [vmem:[#allocation2 + $0x1a0] sm:$0xf0]  ;;  %518 = vmatpush.bf16.msra.mxu1 %v2167_v7  ;;  %v2131_v16 = vor.u32 %v2884_v13, %v2130_v11  ;;  %v2138_v18 = vld [vmem:[#allocation2 + $0x188] sm:$0xf]  ;;  %v2881_v20 = vld [vmem:[#allocation2 + $0x18c] sm:$0xf] }
  0x19   :  { %531 = vmatpush.bf16.msra.mxu2 %v2171_v8  ;;  %v2135_v17 = vor.u32 %v2880_v14, %v2132_v15  ;;  %v2885_v19 = vld [vmem:[#allocation2 + $0x1a4] sm:$0xf0]  ;;  %v2140_v22 = vld [vmem:[#allocation2 + $0x1a8] sm:$0xf0]  ;;  %v2098_v23 = vld [vmem:[#allocation2 + $0x140] sm:$0xf] }
  0x1a   :  { %544 = vmatpush.bf16.msra.mxu3 %v2175_v12  ;;  %v2139_v21 = vor.u32 %v2885_v19, %v2138_v18  ;;  %v2876_v24 = vld [vmem:[#allocation2 + $0x15c] sm:$0xf0]  ;;  %v2143_v25 = vor.u32 %v2881_v20, %v2140_v22  ;;  %v2872_v26 = vld [vmem:[#allocation2 + $0x144] sm:$0xf]  ;;  %v2106_v28 = vld [vmem:[#allocation2 + $0x148] sm:$0xf] }
  0x1b   :  { %v2100_v27 = vld [vmem:[#allocation2 + $0x160] sm:$0xf0]  ;;  %v2099_v29 = vor.u32 %v2876_v24, %v2098_v23  ;;  %v2877_v30 = vld [vmem:[#allocation2 + $0x164] sm:$0xf0]  ;;  %v2873_v31 = vld [vmem:[#allocation2 + $0x14c] sm:$0xf] }
  0x1c   :  { %506 = vmatpush.bf16.msra.mxu0 %v2131_v16  ;;  %v2108_v32 = vld [vmem:[#allocation2 + $0x168] sm:$0xf0]  ;;  %519 = vmatpush.bf16.msra.mxu1 %v2135_v17  ;;  %v2103_v33 = vor.u32 %v2872_v26, %v2100_v27  ;;  %v2107_v34 = vor.u32 %v2877_v30, %v2106_v28  ;;  %v2066_v35 = vld [vmem:[#allocation2 + $0x100] sm:$0xf]  ;;  %v2864_v37 = vld [vmem:[#allocation2 + $0x104] sm:$0xf] }
  0x1d   :  { %532 = vmatpush.bf16.msra.mxu2 %v2139_v21  ;;  %v2868_v36 = vld [vmem:[#allocation2 + $0x11c] sm:$0xf0]  ;;  %v2111_v38 = vor.u32 %v2873_v31, %v2108_v32  ;;  %v2068_v39 = vld [vmem:[#allocation2 + $0x120] sm:$0xf0]  ;;  %v2074_v40 = vld [vmem:[#allocation2 + $0x108] sm:$0xf] }
  0x1e   :  { %545 = vmatpush.bf16.msra.mxu3 %v2143_v25  ;;  %v2869_v41 = vld [vmem:[#allocation2 + $0x124] sm:$0xf0]  ;;  %v2865_v42 = vld [vmem:[#allocation2 + $0x10c] sm:$0xf]  ;;  %v2067_v44 = vor.u32 %v2868_v36, %v2066_v35  ;;  %v2071_v45 = vor.u32 %v2864_v37, %v2068_v39  ;;  %v2034_v47 = vld [vmem:[#allocation2 + $0xc0] sm:$0xf] }
  0x1f   :  { %v2076_v43 = vld [vmem:[#allocation2 + $0x128] sm:$0xf0]  ;;  %v2075_v46 = vor.u32 %v2869_v41, %v2074_v40  ;;  %v2860_v48 = vld [vmem:[#allocation2 + $0xdc] sm:$0xf0]  ;;  %v2856_v49 = vld [vmem:[#allocation2 + $0xc4] sm:$0xf] }
  0x20   :  { %507 = vmatpush.bf16.msra.mxu0 %v2099_v29  ;;  %520 = vmatpush.bf16.msra.mxu1 %v2103_v33  ;;  %v2079_v50 = vor.u32 %v2865_v42, %v2076_v43  ;;  %v2036_v51 = vld [vmem:[#allocation2 + $0xe0] sm:$0xf0]  ;;  %v2042_v52 = vld [vmem:[#allocation2 + $0xc8] sm:$0xf]  ;;  %v2857_v54 = vld [vmem:[#allocation2 + $0xcc] sm:$0xf]  ;;  %v2035_v56 = vor.u32 %v2860_v48, %v2034_v47 }
  0x21   :  { %533 = vmatpush.bf16.msra.mxu2 %v2107_v34  ;;  %v2861_v53 = vld [vmem:[#allocation2 + $0xe4] sm:$0xf0]  ;;  %v2044_v55 = vld [vmem:[#allocation2 + $0xe8] sm:$0xf0]  ;;  %v2039_v57 = vor.u32 %v2856_v49, %v2036_v51  ;;  %v2002_v59 = vld [vmem:[#allocation2 + $0x80] sm:$0xf] }
  0x22   :  { %546 = vmatpush.bf16.msra.mxu3 %v2111_v38  ;;  %v2043_v58 = vor.u32 %v2861_v53, %v2042_v52  ;;  %v2852_v60 = vld [vmem:[#allocation2 + $0x9c] sm:$0xf0]  ;;  %v2848_v61 = vld [vmem:[#allocation2 + $0x84] sm:$0xf]  ;;  %v2047_v62 = vor.u32 %v2857_v54, %v2044_v55  ;;  %v2010_v0 = vld [vmem:[#allocation2 + $0x88] sm:$0xf] }
  0x23   :  { %v2004_v63 = vld [vmem:[#allocation2 + $0xa0] sm:$0xf0]  ;;  %v2853_v1 = vld [vmem:[#allocation2 + $0xa4] sm:$0xf0]  ;;  %v2849_v2 = vld [vmem:[#allocation2 + $0x8c] sm:$0xf]  ;;  %v2003_v4 = vor.u32 %v2852_v60, %v2002_v59 }
  0x24   :  { %508 = vmatpush.bf16.msra.mxu0 %v2067_v44  ;;  %521 = vmatpush.bf16.msra.mxu1 %v2071_v45  ;;  %v2012_v3 = vld [vmem:[#allocation2 + $0xa8] sm:$0xf0]  ;;  %v2007_v5 = vor.u32 %v2848_v61, %v2004_v63  ;;  %v2011_v6 = vor.u32 %v2853_v1, %v2010_v0  ;;  %v1970_v7 = vld [vmem:[#allocation2 + $0x40] sm:$0xf]  ;;  %v2840_v9 = vld [vmem:[#allocation2 + $0x44] sm:$0xf] }
  0x25   :  { %534 = vmatpush.bf16.msra.mxu2 %v2075_v46  ;;  %v2844_v8 = vld [vmem:[#allocation2 + $0x5c] sm:$0xf0]  ;;  %v2015_v10 = vor.u32 %v2849_v2, %v2012_v3  ;;  %v1972_v11 = vld [vmem:[#allocation2 + $0x60] sm:$0xf0]  ;;  %v1978_v12 = vld [vmem:[#allocation2 + $0x48] sm:$0xf] }
  0x26   :  { %547 = vmatpush.bf16.msra.mxu3 %v2079_v50  ;;  %v2845_v13 = vld [vmem:[#allocation2 + $0x64] sm:$0xf0]  ;;  %v2841_v14 = vld [vmem:[#allocation2 + $0x4c] sm:$0xf]  ;;  %v1971_v16 = vor.u32 %v2844_v8, %v1970_v7  ;;  %v1938_v17 = vld [vmem:[#allocation2] sm:$0xf]  ;;  %v1975_v19 = vor.u32 %v2840_v9, %v1972_v11 }
  0x27   :  { %v1980_v15 = vld [vmem:[#allocation2 + $0x68] sm:$0xf0]  ;;  %v2836_v18 = vld [vmem:[#allocation2 + $0x1c] sm:$0xf0]  ;;  %v1979_v20 = vor.u32 %v2845_v13, %v1978_v12  ;;  %v2832_v21 = vld [vmem:[#allocation2 + $0x4] sm:$0xf] }
  0x28   :  { %509 = vmatpush.bf16.msra.mxu0 %v2035_v56  ;;  %522 = vmatpush.bf16.msra.mxu1 %v2039_v57  ;;  %v1940_v22 = vld [vmem:[#allocation2 + $0x20] sm:$0xf0]  ;;  %v1946_v23 = vld [vmem:[#allocation2 + $0x8] sm:$0xf]  ;;  %v1983_v24 = vor.u32 %v2841_v14, %v1980_v15  ;;  %v2833_v26 = vld [vmem:[#allocation2 + $0xc] sm:$0xf]  ;;  %v1939_v31 = vor.u32 %v2836_v18, %v1938_v17 }
  0x29   :  { %535 = vmatpush.bf16.msra.mxu2 %v2043_v58  ;;  %v2837_v25 = vld [vmem:[#allocation2 + $0x24] sm:$0xf0]  ;;  %v1948_v27 = vld [vmem:[#allocation2 + $0x28] sm:$0xf0]  ;;  %v2178_v28 = vld [vmem:[#allocation2 + $0x1d0] sm:$0xf]  ;;  %v1943_v35 = vor.u32 %v2832_v21, %v1940_v22 }
  0x2a   :  { %548 = vmatpush.bf16.msra.mxu3 %v2047_v62  ;;  %v2894_v29 = vld [vmem:[#allocation2 + $0x1ec] sm:$0xf0]  ;;  %v2890_v30 = vld [vmem:[#allocation2 + $0x1d4] sm:$0xf]  ;;  %v2186_v33 = vld [vmem:[#allocation2 + $0x1d8] sm:$0xf]  ;;  %v1947_v36 = vor.u32 %v2837_v25, %v1946_v23  ;;  %v1951_v40 = vor.u32 %v2833_v26, %v1948_v27 }
  0x2b   :  { %v2180_v32 = vld [vmem:[#allocation2 + $0x1f0] sm:$0xf0]  ;;  %v2895_v34 = vld [vmem:[#allocation2 + $0x1f4] sm:$0xf0]  ;;  %v2891_v37 = vld [vmem:[#allocation2 + $0x1dc] sm:$0xf]  ;;  %v2179_v41 = vor.u32 %v2894_v29, %v2178_v28 }
  0x2c   :  { %510 = vmatpush.bf16.msra.mxu0 %v2003_v4  ;;  %523 = vmatpush.bf16.msra.mxu1 %v2007_v5  ;;  %v2188_v38 = vld [vmem:[#allocation2 + $0x1f8] sm:$0xf0]  ;;  %v101_v39 = vld [vmem:[%s3374_s0] sm:$0xff]  ;;  %v2183_v42 = vor.u32 %v2890_v30, %v2180_v32  ;;  %v2187_v43 = vor.u32 %v2895_v34, %v2186_v33  ;;  %v2146_v44 = vld [vmem:[#allocation2 + $0x190] sm:$0xf] }
  0x2d   :  { %536 = vmatpush.bf16.msra.mxu2 %v2011_v6  ;;  %v2886_v45 = vld [vmem:[#allocation2 + $0x1ac] sm:$0xf0]  ;;  %v2882_v46 = vld [vmem:[#allocation2 + $0x194] sm:$0xf]  ;;  %v2191_v47 = vor.u32 %v2891_v37, %v2188_v38  ;;  %v3256_v48 = vpack.c.bf16 %v101_v39, %v101_v39  ;;  %v2154_v50 = vld [vmem:[#allocation2 + $0x198] sm:$0xf] }
  0x2e   :  { %549 = vmatpush.bf16.msra.mxu3 %v2015_v10  ;;  %v2148_v49 = vld [vmem:[#allocation2 + $0x1b0] sm:$0xf0]  ;;  %v2887_v51 = vld [vmem:[#allocation2 + $0x1b4] sm:$0xf0]  ;;  %v2883_v52 = vld [vmem:[#allocation2 + $0x19c] sm:$0xf]  ;;  %v2147_v54 = vor.u32 %v2886_v45, %v2146_v44 }
  0x2f   :  { %v2156_v53 = vld [vmem:[#allocation2 + $0x1b8] sm:$0xf0]  ;;  %v2151_v55 = vor.u32 %v2882_v46, %v2148_v49  ;;  %v2155_v56 = vor.u32 %v2887_v51, %v2154_v50  ;;  %v2114_v57 = vld [vmem:[#allocation2 + $0x150] sm:$0xf]  ;;  %v2874_v59 = vld [vmem:[#allocation2 + $0x154] sm:$0xf] }
  0x30   :  { %511 = vmatpush.bf16.msra.mxu0 %v1971_v16  ;;  %524 = vmatpush.bf16.msra.mxu1 %v1975_v19  ;;  %v2878_v58 = vld [vmem:[#allocation2 + $0x16c] sm:$0xf0]  ;;  %v2159_v60 = vor.u32 %v2883_v52, %v2156_v53  ;;  %v2116_v61 = vld [vmem:[#allocation2 + $0x170] sm:$0xf0]  ;;  %v2122_v62 = vld [vmem:[#allocation2 + $0x158] sm:$0xf] }
  0x31   :  { %537 = vmatpush.bf16.msra.mxu2 %v1979_v20  ;;  %v2879_v63 = vld [vmem:[#allocation2 + $0x174] sm:$0xf0]  ;;  %v2875_v0 = vld [vmem:[#allocation2 + $0x15c] sm:$0xf]  ;;  %v2115_v2 = vor.u32 %v2878_v58, %v2114_v57  ;;  %v2119_v3 = vor.u32 %v2874_v59, %v2116_v61  ;;  %v2082_v5 = vld [vmem:[#allocation2 + $0x110] sm:$0xf] }
  0x32   :  { %550 = vmatpush.bf16.msra.mxu3 %v1983_v24  ;;  %v2124_v1 = vld [vmem:[#allocation2 + $0x178] sm:$0xf0]  ;;  %v2123_v4 = vor.u32 %v2879_v63, %v2122_v62  ;;  %v2870_v6 = vld [vmem:[#allocation2 + $0x12c] sm:$0xf0]  ;;  %v2866_v7 = vld [vmem:[#allocation2 + $0x114] sm:$0xf] }
  0x33   :  { %v2127_v8 = vor.u32 %v2875_v0, %v2124_v1  ;;  %v2084_v9 = vld [vmem:[#allocation2 + $0x130] sm:$0xf0]  ;;  %v2090_v10 = vld [vmem:[#allocation2 + $0x118] sm:$0xf]  ;;  %v2867_v12 = vld [vmem:[#allocation2 + $0x11c] sm:$0xf]  ;;  %v2083_v14 = vor.u32 %v2870_v6, %v2082_v5 }
  0x34   :  { %512 = vmatpush.bf16.msra.mxu0 %v1939_v31  ;;  %525 = vmatpush.bf16.msra.mxu1 %v1943_v35  ;;  %v2871_v11 = vld [vmem:[#allocation2 + $0x134] sm:$0xf0]  ;;  %v2092_v13 = vld [vmem:[#allocation2 + $0x138] sm:$0xf0]  ;;  %v2087_v15 = vor.u32 %v2866_v7, %v2084_v9  ;;  %v2050_v17 = vld [vmem:[#allocation2 + $0xd0] sm:$0xf] }
  0x35   :  { %538 = vmatpush.bf16.msra.mxu2 %v1947_v36  ;;  %v2091_v16 = vor.u32 %v2871_v11, %v2090_v10  ;;  %v2862_v18 = vld [vmem:[#allocation2 + $0xec] sm:$0xf0]  ;;  %v2858_v19 = vld [vmem:[#allocation2 + $0xd4] sm:$0xf]  ;;  %v2095_v20 = vor.u32 %v2867_v12, %v2092_v13  ;;  %v2058_v22 = vld [vmem:[#allocation2 + $0xd8] sm:$0xf] }
  0x36   :  { %551 = vmatpush.bf16.msra.mxu3 %v1951_v40  ;;  %v2052_v21 = vld [vmem:[#allocation2 + $0xf0] sm:$0xf0]  ;;  %v2863_v23 = vld [vmem:[#allocation2 + $0xf4] sm:$0xf0]  ;;  %v2859_v24 = vld [vmem:[#allocation2 + $0xdc] sm:$0xf]  ;;  %v2051_v26 = vor.u32 %v2862_v18, %v2050_v17 }
  0x37   :  { %513 = vmatmul.bf16.vlgmr.msra.gmra.mxu0 %v3256_v48  ;;  %526 = vmatmul.bf16.vlgmr.msra.gmra.mxu1 %v3256_v48  ;;  %v2060_v25 = vld [vmem:[#allocation2 + $0xf8] sm:$0xf0]  ;;  %v2055_v27 = vor.u32 %v2858_v19, %v2052_v21  ;;  %v2059_v28 = vor.u32 %v2863_v23, %v2058_v22  ;;  %v2018_v29 = vld [vmem:[#allocation2 + $0x90] sm:$0xf]  ;;  %v2850_v31 = vld [vmem:[#allocation2 + $0x94] sm:$0xf] }
  0x38   :  { %557 = vmatpush.bf16.msrb.mxu0 %v2179_v41  ;;  %570 = vmatpush.bf16.msrb.mxu1 %v2183_v42  ;;  %v2854_v30 = vld [vmem:[#allocation2 + $0xac] sm:$0xf0]  ;;  %v2063_v32 = vor.u32 %v2859_v24, %v2060_v25  ;;  %v2020_v33 = vld [vmem:[#allocation2 + $0xb0] sm:$0xf0]  ;;  %v2026_v34 = vld [vmem:[#allocation2 + $0x98] sm:$0xf] }
  0x39   :  { %583 = vmatpush.bf16.msrb.mxu2 %v2187_v43  ;;  %552 = vmatmul.bf16.vlgmr.msra.gmra.mxu3 %v3256_v48  ;;  %v2855_v35 = vld [vmem:[#allocation2 + $0xb4] sm:$0xf0]  ;;  %v2851_v36 = vld [vmem:[#allocation2 + $0x9c] sm:$0xf]  ;;  %v2019_v38 = vor.u32 %v2854_v30, %v2018_v29  ;;  %v2023_v39 = vor.u32 %v2850_v31, %v2020_v33  ;;  %v1986_v41 = vld [vmem:[#allocation2 + $0x50] sm:$0xf] }
  0x3a   :  { %596 = vmatpush.bf16.msrb.mxu3 %v2191_v47  ;;  %539 = vmatmul.bf16.vlgmr.msra.gmra.mxu2 %v3256_v48  ;;  %v2028_v37 = vld [vmem:[#allocation2 + $0xb8] sm:$0xf0]  ;;  %v2027_v40 = vor.u32 %v2855_v35, %v2026_v34  ;;  %v2846_v42 = vld [vmem:[#allocation2 + $0x6c] sm:$0xf0]  ;;  %v2842_v43 = vld [vmem:[#allocation2 + $0x54] sm:$0xf] }
  0x3b   :  { %v2031_v44 = vor.u32 %v2851_v36, %v2028_v37  ;;  %v1988_v45 = vld [vmem:[#allocation2 + $0x70] sm:$0xf0]  ;;  %v1994_v46 = vld [vmem:[#allocation2 + $0x58] sm:$0xf]  ;;  %v2843_v49 = vld [vmem:[#allocation2 + $0x5c] sm:$0xf]  ;;  %v1987_v51 = vor.u32 %v2846_v42, %v1986_v41 }
  0x3c   :  { %558 = vmatpush.bf16.msrb.mxu0 %v2147_v54  ;;  %571 = vmatpush.bf16.msrb.mxu1 %v2151_v55  ;;  %v2847_v47 = vld [vmem:[#allocation2 + $0x74] sm:$0xf0]  ;;  %v1996_v50 = vld [vmem:[#allocation2 + $0x78] sm:$0xf0]  ;;  %v1954_v52 = vld [vmem:[#allocation2 + $0x10] sm:$0xf]  ;;  %v1991_v53 = vor.u32 %v2842_v43, %v1988_v45 }
  0x3d   :  { %584 = vmatpush.bf16.msrb.mxu2 %v2155_v56  ;;  %v1995_v54 = vor.u32 %v2847_v47, %v1994_v46  ;;  %v2838_v55 = vld [vmem:[#allocation2 + $0x2c] sm:$0xf0]  ;;  %v2834_v56 = vld [vmem:[#allocation2 + $0x14] sm:$0xf]  ;;  %v1999_v58 = vor.u32 %v2843_v49, %v1996_v50  ;;  %v1962_v59 = vld [vmem:[#allocation2 + $0x18] sm:$0xf] }
  0x3e   :  { %597 = vmatpush.bf16.msrb.mxu3 %v2159_v60  ;;  %v1956_v57 = vld [vmem:[#allocation2 + $0x30] sm:$0xf0]  ;;  %v2839_v60 = vld [vmem:[#allocation2 + $0x34] sm:$0xf0]  ;;  %v2835_v61 = vld [vmem:[#allocation2 + $0x1c] sm:$0xf]  ;;  %v1955_v1 = vor.u32 %v2838_v55, %v1954_v52 }
  0x3f   :  { %v1964_v62 = vld [vmem:[#allocation2 + $0x38] sm:$0xf0]  ;;  %v2250_v63 = vld [vmem:[#allocation4 + $0x70] sm:$0xf]  ;;  %v2911_v0 = vld [vmem:[#allocation4 + $0x74] sm:$0xf0]  ;;  %v1963_v5 = vor.u32 %v2839_v60, %v1962_v59 }
  0x40   :  { %559 = vmatpush.bf16.msrb.mxu0 %v2115_v2  ;;  %572 = vmatpush.bf16.msrb.mxu1 %v2119_v3  ;;  %v2314_v2 = vld [vmem:[#allocation4 + $0xf0] sm:$0xf]  ;;  %v2927_v3 = vld [vmem:[#allocation4 + $0xf4] sm:$0xf0]  ;;  %v1967_v6 = vor.u32 %v2835_v61, %v1964_v62  ;;  %v2251_v7 = vor.u32 %v2911_v0, %v2250_v63  ;;  %v2909_v12 = vld [vmem:[#allocation4 + $0x64] sm:$0xf0] }
  0x41   :  { %585 = vmatpush.bf16.msrb.mxu2 %v2123_v4  ;;  %v1959_v4 = vor.u32 %v2834_v56, %v1956_v57  ;;  %v2378_v9 = vld [vmem:[#allocation4 + $0x170] sm:$0xf]  ;;  %v2943_v10 = vld [vmem:[#allocation4 + $0x174] sm:$0xf0]  ;;  %v2315_v11 = vor.u32 %v2927_v3, %v2314_v2  ;;  %v2370_v21 = vld [vmem:[#allocation4 + $0x160] sm:$0xf] }
  0x42   :  { %598 = vmatpush.bf16.msrb.mxu3 %v2127_v8  ;;  %v2242_v8 = vld [vmem:[#allocation4 + $0x60] sm:$0xf]  ;;  %v2442_v13 = vld [vmem:[#allocation4 + $0x1f0] sm:$0xf]  ;;  %v2379_v17 = vor.u32 %v2943_v10, %v2378_v9  ;;  %v2941_v22 = vld [vmem:[#allocation4 + $0x164] sm:$0xf0] }
  0x43   :  { %v2243_v18 = vor.u32 %v2909_v12, %v2242_v8  ;;  %v2907_v24 = vld [vmem:[#allocation4 + $0x54] sm:$0xf0]  ;;  %v2434_v25 = vld [vmem:[#allocation4 + $0x1e0] sm:$0xf]  ;;  %v2371_v29 = vor.u32 %v2941_v22, %v2370_v21  ;;  %v2362_v33 = vld [vmem:[#allocation4 + $0x150] sm:$0xf] }
  0x44   :  { %560 = vmatpush.bf16.msrb.mxu0 %v2083_v14  ;;  %573 = vmatpush.bf16.msrb.mxu1 %v2087_v15  ;;  %v2959_v14 = vld [vmem:[#allocation4 + $0x1f4] sm:$0xf0]  ;;  %v2306_v15 = vld [vmem:[#allocation4 + $0xe0] sm:$0xf]  ;;  %v2905_v36 = vld [vmem:[#allocation4 + $0x44] sm:$0xf0] }
  0x45   :  { %586 = vmatpush.bf16.msrb.mxu2 %v2091_v16  ;;  %v2925_v16 = vld [vmem:[#allocation4 + $0xe4] sm:$0xf0]  ;;  %v2443_v19 = vor.u32 %v2959_v14, %v2442_v13  ;;  %v2939_v34 = vld [vmem:[#allocation4 + $0x154] sm:$0xf0]  ;;  %v2426_v37 = vld [vmem:[#allocation4 + $0x1d0] sm:$0xf] }
  0x46   :  { %599 = vmatpush.bf16.msrb.mxu3 %v2095_v20  ;;  %v2234_v20 = vld [vmem:[#allocation4 + $0x50] sm:$0xf]  ;;  %v2307_v23 = vor.u32 %v2925_v16, %v2306_v15  ;;  %v2363_v41 = vor.u32 %v2939_v34, %v2362_v33  ;;  %v2354_v45 = vld [vmem:[#allocation4 + $0x140] sm:$0xf]  ;;  %v2937_v46 = vld [vmem:[#allocation4 + $0x144] sm:$0xf0] }
  0x47   :  { %v2235_v30 = vor.u32 %v2907_v24, %v2234_v20  ;;  %v2218_v42 = vld [vmem:[#allocation4 + $0x30] sm:$0xf]  ;;  %v2418_v49 = vld [vmem:[#allocation4 + $0x1c0] sm:$0xf]  ;;  %v2953_v50 = vld [vmem:[#allocation4 + $0x1c4] sm:$0xf0] }
  0x48   :  { %561 = vmatpush.bf16.msrb.mxu0 %v2051_v26  ;;  %574 = vmatpush.bf16.msrb.mxu1 %v2055_v27  ;;  %v2957_v26 = vld [vmem:[#allocation4 + $0x1e4] sm:$0xf0]  ;;  %v2298_v27 = vld [vmem:[#allocation4 + $0xd0] sm:$0xf]  ;;  %v2919_v52 = vld [vmem:[#allocation4 + $0xb4] sm:$0xf0]  ;;  %v2419_v56 = vor.u32 %v2953_v50, %v2418_v49 }
  0x49   :  { %587 = vmatpush.bf16.msrb.mxu2 %v2059_v28  ;;  %v2923_v28 = vld [vmem:[#allocation4 + $0xd4] sm:$0xf0]  ;;  %v2435_v31 = vor.u32 %v2957_v26, %v2434_v25  ;;  %v2346_v57 = vld [vmem:[#allocation4 + $0x130] sm:$0xf]  ;;  %v2901_v60 = vld [vmem:[#allocation4 + $0x24] sm:$0xf0] }
  0x4a   :  { %600 = vmatpush.bf16.msrb.mxu3 %v2063_v32  ;;  %v2226_v32 = vld [vmem:[#allocation4 + $0x40] sm:$0xf]  ;;  %v2299_v35 = vor.u32 %v2923_v28, %v2298_v27  ;;  %v2410_v61 = vld [vmem:[#allocation4 + $0x1b0] sm:$0xf]  ;;  %v2951_v62 = vld [vmem:[#allocation4 + $0x1b4] sm:$0xf0] }
  0x4b   :  { %v2227_v43 = vor.u32 %v2905_v36, %v2226_v32  ;;  %v2274_v63 = vld [vmem:[#allocation4 + $0xa0] sm:$0xf]  ;;  %v2917_v0 = vld [vmem:[#allocation4 + $0xa4] sm:$0xf0]  ;;  %v2411_v3 = vor.u32 %v2951_v62, %v2410_v61  ;;  %v2899_v8 = vld [vmem:[#allocation4 + $0x14] sm:$0xf0] }
  0x4c   :  { %562 = vmatpush.bf16.msrb.mxu0 %v2019_v38  ;;  %575 = vmatpush.bf16.msrb.mxu1 %v2023_v39  ;;  %v2955_v38 = vld [vmem:[#allocation4 + $0x1d4] sm:$0xf0]  ;;  %v2290_v39 = vld [vmem:[#allocation4 + $0xc0] sm:$0xf]  ;;  %v2949_v10 = vld [vmem:[#allocation4 + $0x1a4] sm:$0xf0] }
  0x4d   :  { %588 = vmatpush.bf16.msrb.mxu2 %v2027_v40  ;;  %v2921_v40 = vld [vmem:[#allocation4 + $0xc4] sm:$0xf0]  ;;  %v2402_v9 = vld [vmem:[#allocation4 + $0x1a0] sm:$0xf]  ;;  %v2915_v12 = vld [vmem:[#allocation4 + $0x94] sm:$0xf0] }
  0x4e   :  { %601 = vmatpush.bf16.msrb.mxu3 %v2031_v44  ;;  %v2427_v44 = vor.u32 %v2955_v38, %v2426_v37  ;;  %v2291_v47 = vor.u32 %v2921_v40, %v2290_v39  ;;  %v2194_v14 = vld [vmem:[#allocation4] sm:$0xf]  ;;  %v2403_v16 = vor.u32 %v2949_v10, %v2402_v9  ;;  %v2394_v22 = vld [vmem:[#allocation4 + $0x190] sm:$0xf]  ;;  %v2913_v24 = vld [vmem:[#allocation4 + $0x84] sm:$0xf0] }
  0x4f   :  { %v2258_v21 = vld [vmem:[#allocation4 + $0x80] sm:$0xf]  ;;  %v2506_v25 = vld [vmem:[#allocation4 + $0x270] sm:$0xf]  ;;  %v2975_v26 = vld [vmem:[#allocation4 + $0x274] sm:$0xf0] }
  0x50   :  { %563 = vmatpush.bf16.msrb.mxu0 %v1987_v51  ;;  %576 = vmatpush.bf16.msrb.mxu1 %v1991_v53  ;;  %v2282_v51 = vld [vmem:[#allocation4 + $0xb0] sm:$0xf]  ;;  %v2355_v53 = vor.u32 %v2937_v46, %v2354_v45  ;;  %v2991_v28 = vld [vmem:[#allocation4 + $0x2f4] sm:$0xf0]  ;;  %v2498_v32 = vld [vmem:[#allocation4 + $0x260] sm:$0xf]  ;;  %v2259_v36 = vor.u32 %v2913_v24, %v2258_v21  ;;  %v2507_v37 = vor.u32 %v2975_v26, %v2506_v25 }
  0x51   :  { %589 = vmatpush.bf16.msrb.mxu2 %v1995_v54  ;;  %v2210_v54 = vld [vmem:[#allocation4 + $0x20] sm:$0xf]  ;;  %v2283_v59 = vor.u32 %v2919_v52, %v2282_v51  ;;  %v2570_v27 = vld [vmem:[#allocation4 + $0x2f0] sm:$0xf]  ;;  %v2929_v34 = vld [vmem:[#allocation4 + $0x104] sm:$0xf0] }
  0x52   :  { %602 = vmatpush.bf16.msrb.mxu3 %v1999_v58  ;;  %v2935_v58 = vld [vmem:[#allocation4 + $0x134] sm:$0xf0]  ;;  %v2211_v2 = vor.u32 %v2901_v60, %v2210_v54  ;;  %v2322_v33 = vld [vmem:[#allocation4 + $0x100] sm:$0xf]  ;;  %v2945_v38 = vld [vmem:[#allocation4 + $0x184] sm:$0xf0] }
  0x53   :  { %v2634_v39 = vld [vmem:[#allocation4 + $0x370] sm:$0xf]  ;;  %v3007_v40 = vld [vmem:[#allocation4 + $0x374] sm:$0xf0]  ;;  %v2989_v45 = vld [vmem:[#allocation4 + $0x2e4] sm:$0xf0]  ;;  %v2323_v46 = vor.u32 %v2929_v34, %v2322_v33 }
  0x54   :  { %564 = vmatpush.bf16.msrb.mxu0 %v1955_v1  ;;  %577 = vmatpush.bf16.msrb.mxu1 %v1959_v4  ;;  %v2347_v1 = vor.u32 %v2935_v58, %v2346_v57  ;;  %v2202_v4 = vld [vmem:[#allocation4 + $0x10] sm:$0xf]  ;;  %v2635_v49 = vor.u32 %v3007_v40, %v2634_v39  ;;  %v3005_v54 = vld [vmem:[#allocation4 + $0x364] sm:$0xf0]  ;;  %v2690_v57 = vld [vmem:[#allocation4 + $0x3e0] sm:$0xf] }
  0x55   :  { %590 = vmatpush.bf16.msrb.mxu2 %v1963_v5  ;;  %v2338_v5 = vld [vmem:[#allocation4 + $0x120] sm:$0xf]  ;;  %v2203_v15 = vor.u32 %v2899_v8, %v2202_v4  ;;  %v2490_v52 = vld [vmem:[#allocation4 + $0x250] sm:$0xf]  ;;  %v3021_v58 = vld [vmem:[#allocation4 + $0x3e4] sm:$0xf0] }
  0x56   :  { %603 = vmatpush.bf16.msrb.mxu3 %v1967_v6  ;;  %v2933_v6 = vld [vmem:[#allocation4 + $0x124] sm:$0xf0]  ;;  %v2987_v60 = vld [vmem:[#allocation4 + $0x2d4] sm:$0xf0]  ;;  %v2466_v24 = vld [vmem:[#allocation4 + $0x220] sm:$0xf] }
  0x57   :  { %565 = vmatmul.bf16.vlgmr.msrb.gmra.mxu0 %v3256_v48  ;;  %578 = vmatmul.bf16.vlgmr.msrb.gmra.mxu1 %v3256_v48  ;;  %v2339_v13 = vor.u32 %v2933_v6, %v2338_v5  ;;  %v2969_v4 = vld [vmem:[#allocation4 + $0x244] sm:$0xf0]  ;;  %v2682_v5 = vld [vmem:[#allocation4 + $0x3d0] sm:$0xf]  ;;  %v3019_v6 = vld [vmem:[#allocation4 + $0x3d4] sm:$0xf0] }
  0x58   :  { %1391 = vmatpush.bf16.msra.mxu0 %v2251_v7  ;;  %1404 = vmatpush.bf16.msra.mxu1 %v2315_v11  ;;  %v2275_v7 = vor.u32 %v2917_v0, %v2274_v63  ;;  %v2266_v11 = vld [vmem:[#allocation4 + $0x90] sm:$0xf]  ;;  %v2691_v63 = vor.u32 %v3021_v58, %v2690_v57  ;;  %v2482_v0 = vld [vmem:[#allocation4 + $0x240] sm:$0xf]  ;;  %v2985_v8 = vld [vmem:[#allocation4 + $0x2c4] sm:$0xf0] }
  0x59   :  { %591 = vmatmul.bf16.vlgmr.msrb.gmra.mxu2 %v3256_v48  ;;  %604 = vmatmul.bf16.vlgmr.msrb.gmra.mxu3 %v3256_v48  ;;  %v2903_v48 = vld [vmem:[#allocation4 + $0x34] sm:$0xf0]  ;;  %v2267_v20 = vor.u32 %v2915_v12, %v2266_v11  ;;  %v2483_v10 = vor.u32 %v2969_v4, %v2482_v0  ;;  %v2683_v11 = vor.u32 %v3019_v6, %v2682_v5  ;;  %v2474_v12 = vld [vmem:[#allocation4 + $0x230] sm:$0xf]  ;;  %v2642_v0 = vld [vmem:[#allocation4 + $0x380] sm:$0xf] }
  0x5a   :  { %1417 = vmatpush.bf16.msra.mxu2 %v2379_v17  ;;  %1430 = vmatpush.bf16.msra.mxu3 %v2443_v19  ;;  %v2219_v55 = vor.u32 %v2903_v48, %v2218_v42  ;;  %v2897_v17 = vld [vmem:[#allocation4 + $0x4] sm:$0xf0]  ;;  %v2931_v19 = vld [vmem:[#allocation4 + $0x114] sm:$0xf0]  ;;  %v2698_v48 = vld [vmem:[#allocation4 + $0x3f0] sm:$0xf] }
  0x5b   :  { %v2973_v42 = vld [vmem:[#allocation4 + $0x264] sm:$0xf0]  ;;  %v2602_v25 = vld [vmem:[#allocation4 + $0x330] sm:$0xf]  ;;  %v2999_v26 = vld [vmem:[#allocation4 + $0x334] sm:$0xf0] }
  0x5c   :  { %1392 = vmatpush.bf16.msra.mxu0 %v2243_v18  ;;  %1405 = vmatpush.bf16.msra.mxu1 %v2307_v23  ;;  %v2330_v18 = vld [vmem:[#allocation4 + $0x110] sm:$0xf]  ;;  %v2947_v23 = vld [vmem:[#allocation4 + $0x194] sm:$0xf0]  ;;  %v2499_v50 = vor.u32 %v2973_v42, %v2498_v32  ;;  %v2981_v32 = vld [vmem:[#allocation4 + $0x2a4] sm:$0xf0]  ;;  %v2603_v33 = vor.u32 %v2999_v26, %v2602_v25 }
  0x5d   :  { %v2522_v39 = vld [vmem:[#allocation4 + $0x290] sm:$0xf]  ;;  %v2910_v6 = vld [vmem:[#allocation4 + $0x74] sm:$0xf]  ;;  %v2380_v26 = vld [vmem:[#allocation4 + $0x178] sm:$0xf0] }
  0x5e   :  { %1418 = vmatpush.bf16.msra.mxu2 %v2371_v29  ;;  %1431 = vmatpush.bf16.msra.mxu3 %v2435_v31  ;;  %v2331_v29 = vor.u32 %v2931_v19, %v2330_v18  ;;  %v2395_v31 = vor.u32 %v2947_v23, %v2394_v22  ;;  %v3017_v18 = vld [vmem:[#allocation4 + $0x3c4] sm:$0xf0]  ;;  %v2538_v19 = vld [vmem:[#allocation4 + $0x2b0] sm:$0xf] }
  0x5f   :  { %v2650_v58 = vld [vmem:[#allocation4 + $0x390] sm:$0xf] }
  0x60   :  { %1393 = vmatpush.bf16.msra.mxu0 %v2235_v30  ;;  %1406 = vmatpush.bf16.msra.mxu1 %v2299_v35  ;;  %v2195_v30 = vor.u32 %v2897_v17, %v2194_v14  ;;  %v2386_v35 = vld [vmem:[#allocation4 + $0x180] sm:$0xf]  ;;  %v3001_v14 = vld [vmem:[#allocation4 + $0x344] sm:$0xf0] }
  0x61   :  { %v2674_v17 = vld [vmem:[#allocation4 + $0x3c0] sm:$0xf] }
  0x62   :  { %1419 = vmatpush.bf16.msra.mxu2 %v2363_v41  ;;  %1432 = vmatpush.bf16.msra.mxu3 %v2427_v44  ;;  %v2571_v41 = vor.u32 %v2991_v28, %v2570_v27  ;;  %v2562_v44 = vld [vmem:[#allocation4 + $0x2e0] sm:$0xf]  ;;  %v2675_v23 = vor.u32 %v3017_v18, %v2674_v17  ;;  %v2965_v28 = vld [vmem:[#allocation4 + $0x224] sm:$0xf0] }
  0x63   :  { %v2467_v34 = vor.u32 %v2965_v28, %v2466_v24  ;;  %v2942_v24 = vld [vmem:[#allocation4 + $0x174] sm:$0xf]  ;;  %v2444_v28 = vld [vmem:[#allocation4 + $0x1f8] sm:$0xf0] }
  0x64   :  { %1394 = vmatpush.bf16.msra.mxu0 %v2227_v43  ;;  %1407 = vmatpush.bf16.msra.mxu1 %v2291_v47  ;;  %v3023_v43 = vld [vmem:[#allocation4 + $0x3f4] sm:$0xf0]  ;;  %v2387_v47 = vor.u32 %v2945_v38, %v2386_v35 }
  0x65   :  { %v2699_v51 = vor.u32 %v3023_v43, %v2698_v48  ;;  %v2963_v38 = vld [vmem:[#allocation4 + $0x214] sm:$0xf0]  ;;  %v2594_v48 = vld [vmem:[#allocation4 + $0x320] sm:$0xf]  ;;  %v2997_v43 = vld [vmem:[#allocation4 + $0x324] sm:$0xf0] }
  0x66   :  { %1420 = vmatpush.bf16.msra.mxu2 %v2355_v53  ;;  %1433 = vmatpush.bf16.msra.mxu3 %v2419_v56  ;;  %v2626_v53 = vld [vmem:[#allocation4 + $0x360] sm:$0xf]  ;;  %v2971_v56 = vld [vmem:[#allocation4 + $0x254] sm:$0xf0] }
  0x67   :  { %v2627_v61 = vor.u32 %v3005_v54, %v2626_v53  ;;  %v2491_v62 = vor.u32 %v2971_v56, %v2490_v52  ;;  %v2977_v53 = vld [vmem:[#allocation4 + $0x284] sm:$0xf0]  ;;  %v2995_v56 = vld [vmem:[#allocation4 + $0x314] sm:$0xf0] }
  0x68   :  { %1395 = vmatpush.bf16.msra.mxu0 %v2219_v55  ;;  %1408 = vmatpush.bf16.msra.mxu1 %v2283_v59  ;;  %v2563_v55 = vor.u32 %v2989_v45, %v2562_v44  ;;  %v2554_v59 = vld [vmem:[#allocation4 + $0x2d0] sm:$0xf]  ;;  %v2595_v44 = vor.u32 %v2997_v43, %v2594_v48  ;;  %v2658_v45 = vld [vmem:[#allocation4 + $0x3a0] sm:$0xf] }
  0x6a   :  { %1421 = vmatpush.bf16.msra.mxu2 %v2347_v1  ;;  %1434 = vmatpush.bf16.msra.mxu3 %v2411_v3  ;;  %v2618_v1 = vld [vmem:[#allocation4 + $0x350] sm:$0xf]  ;;  %v2555_v3 = vor.u32 %v2987_v60, %v2554_v59  ;;  %v3011_v59 = vld [vmem:[#allocation4 + $0x394] sm:$0xf0] }
  0x6b   :  { %v2651_v60 = vor.u32 %v3011_v59, %v2650_v58  ;;  %v2364_v58 = vld [vmem:[#allocation4 + $0x158] sm:$0xf0]  ;;  %v2954_v59 = vld [vmem:[#allocation4 + $0x1d4] sm:$0xf] }
  0x6c   :  { %1396 = vmatpush.bf16.msra.mxu0 %v2211_v2  ;;  %1409 = vmatpush.bf16.msra.mxu1 %v2275_v7  ;;  %v3003_v2 = vld [vmem:[#allocation4 + $0x354] sm:$0xf0]  ;;  %v2546_v7 = vld [vmem:[#allocation4 + $0x2c0] sm:$0xf] }
  0x6d   :  { %v2619_v9 = vor.u32 %v3003_v2, %v2618_v1  ;;  %v3009_v1 = vld [vmem:[#allocation4 + $0x384] sm:$0xf0] }
  0x6e   :  { %1422 = vmatpush.bf16.msra.mxu2 %v2339_v13  ;;  %1435 = vmatpush.bf16.msra.mxu3 %v2403_v16  ;;  %v2610_v13 = vld [vmem:[#allocation4 + $0x340] sm:$0xf]  ;;  %v2967_v16 = vld [vmem:[#allocation4 + $0x234] sm:$0xf0]  ;;  %v2643_v2 = vor.u32 %v3009_v1, %v2642_v0  ;;  %v2902_v0 = vld [vmem:[#allocation4 + $0x34] sm:$0xf] }
  0x6f   :  { %v2611_v21 = vor.u32 %v3001_v14, %v2610_v13  ;;  %v2475_v22 = vor.u32 %v2967_v16, %v2474_v12  ;;  %v2220_v1 = vld [vmem:[#allocation4 + $0x38] sm:$0xf0] }
  0x70   :  { %1397 = vmatpush.bf16.msra.mxu0 %v2203_v15  ;;  %1410 = vmatpush.bf16.msra.mxu1 %v2267_v20  ;;  %v2547_v15 = vor.u32 %v2985_v8, %v2546_v7  ;;  %v2983_v20 = vld [vmem:[#allocation4 + $0x2b4] sm:$0xf0]  ;;  %v2252_v7 = vld [vmem:[#allocation4 + $0x78] sm:$0xf0] }
  0x71   :  { %v2539_v27 = vor.u32 %v2983_v20, %v2538_v19  ;;  %v2908_v19 = vld [vmem:[#allocation4 + $0x64] sm:$0xf]  ;;  %v2244_v20 = vld [vmem:[#allocation4 + $0x68] sm:$0xf0] }
  0x72   :  { %1423 = vmatpush.bf16.msra.mxu2 %v2331_v29  ;;  %1436 = vmatpush.bf16.msra.mxu3 %v2395_v31  ;;  %v2666_v29 = vld [vmem:[#allocation4 + $0x3b0] sm:$0xf]  ;;  %v2530_v31 = vld [vmem:[#allocation4 + $0x2a0] sm:$0xf] }
  0x74   :  { %1398 = vmatpush.bf16.msra.mxu0 %v2195_v30  ;;  %1411 = vmatpush.bf16.msra.mxu1 %v2259_v36  ;;  %v3015_v30 = vld [vmem:[#allocation4 + $0x3b4] sm:$0xf0]  ;;  %v2531_v36 = vor.u32 %v2981_v32, %v2530_v31  ;;  %v2247_v31 = vor.u32 %v2908_v19, %v2244_v20  ;;  %v2276_v19 = vld [vmem:[#allocation4 + $0xa8] sm:$0xf0]  ;;  %v2934_v20 = vld [vmem:[#allocation4 + $0x134] sm:$0xf] }
  0x75   :  { %v2667_v35 = vor.u32 %v3015_v30, %v2666_v29 }
  0x76   :  { %1424 = vmatpush.bf16.msra.mxu2 %v2323_v46  ;;  %1437 = vmatpush.bf16.msra.mxu3 %v2387_v47  ;;  %v3013_v46 = vld [vmem:[#allocation4 + $0x3a4] sm:$0xf0] }
  0x77   :  { %v2659_v47 = vor.u32 %v3013_v46, %v2658_v45  ;;  %v2956_v45 = vld [vmem:[#allocation4 + $0x1e4] sm:$0xf]  ;;  %v2436_v46 = vld [vmem:[#allocation4 + $0x1e8] sm:$0xf0] }
  0x78   :  { %1443 = vmatpush.bf16.msrb.mxu0 %v2507_v37  ;;  %1456 = vmatpush.bf16.msrb.mxu1 %v2571_v41  ;;  %v2458_v37 = vld [vmem:[#allocation4 + $0x210] sm:$0xf]  ;;  %v2979_v41 = vld [vmem:[#allocation4 + $0x294] sm:$0xf0] }
  0x79   :  { %v2459_v40 = vor.u32 %v2963_v38, %v2458_v37  ;;  %v2523_v42 = vor.u32 %v2979_v41, %v2522_v39  ;;  %v2383_v38 = vor.u32 %v2942_v24, %v2380_v26  ;;  %v2300_v41 = vld [vmem:[#allocation4 + $0xd8] sm:$0xf0] }
  0x7a   :  { %1469 = vmatpush.bf16.msrb.mxu2 %v2635_v49  ;;  %1482 = vmatpush.bf16.msrb.mxu3 %v2699_v51  ;;  %v2450_v49 = vld [vmem:[#allocation4 + $0x200] sm:$0xf]  ;;  %v2412_v24 = vld [vmem:[#allocation4 + $0x1b8] sm:$0xf0] }
  0x7b   :  { %v2514_v51 = vld [vmem:[#allocation4 + $0x280] sm:$0xf] }
  0x7c   :  { %1444 = vmatpush.bf16.msrb.mxu0 %v2499_v50  ;;  %1457 = vmatpush.bf16.msrb.mxu1 %v2563_v55  ;;  %v2961_v50 = vld [vmem:[#allocation4 + $0x204] sm:$0xf0]  ;;  %v2515_v54 = vor.u32 %v2977_v53, %v2514_v51  ;;  %v2586_v55 = vld [vmem:[#allocation4 + $0x310] sm:$0xf]  ;;  %v2228_v51 = vld [vmem:[#allocation4 + $0x48] sm:$0xf0]  ;;  %v2439_v53 = vor.u32 %v2956_v45, %v2436_v46 }
  0x7d   :  { %v2451_v52 = vor.u32 %v2961_v50, %v2450_v49  ;;  %v2587_v57 = vor.u32 %v2995_v56, %v2586_v55  ;;  %v2904_v50 = vld [vmem:[#allocation4 + $0x44] sm:$0xf]  ;;  %v2292_v55 = vld [vmem:[#allocation4 + $0xc8] sm:$0xf0]  ;;  %v2938_v56 = vld [vmem:[#allocation4 + $0x154] sm:$0xf] }
  0x7e   :  { %1470 = vmatpush.bf16.msrb.mxu2 %v2627_v61  ;;  %1483 = vmatpush.bf16.msrb.mxu3 %v2691_v63  ;;  %v2578_v61 = vld [vmem:[#allocation4 + $0x300] sm:$0xf]  ;;  %v2260_v45 = vld [vmem:[#allocation4 + $0x88] sm:$0xf0] }
  0x80   :  { %1445 = vmatpush.bf16.msrb.mxu0 %v2491_v62  ;;  %1458 = vmatpush.bf16.msrb.mxu1 %v2555_v3  ;;  %v2993_v62 = vld [vmem:[#allocation4 + $0x304] sm:$0xf0]  ;;  %v3269_v3 = vld [vmem:[%s3376_s2] sm:$0xff] }
  0x81   :  { %v2579_v63 = vor.u32 %v2993_v62, %v2578_v61  ;;  %v169_v4 = vperm.slane %v3269_v3, 0  ;;  %v170_v5 = vperm.slane %v3269_v3, 1  ;;  %v171_v14 = vperm.slane %v3269_v3, 2 }
  0x82   :  { %1471 = vmatpush.bf16.msrb.mxu2 %v2619_v9  ;;  %1484 = vmatpush.bf16.msrb.mxu3 %v2683_v11  ;;  %v2926_v9 = vld [vmem:[#allocation4 + $0xf4] sm:$0xf]  ;;  %v172_v17 = vperm.slane %v3269_v3, 3  ;;  %v2231_v62 = vor.u32 %v2904_v50, %v2228_v51  ;;  %v2508_v51 = vld [vmem:[#allocation4 + $0x278] sm:$0xf0] }
  0x83   :  { %v2974_v50 = vld [vmem:[#allocation4 + $0x274] sm:$0xf] }
  0x84   :  { %1446 = vmatpush.bf16.msrb.mxu0 %v2483_v10  ;;  %1459 = vmatpush.bf16.msrb.mxu1 %v2547_v15  ;;  %v2316_v10 = vld [vmem:[#allocation4 + $0xf8] sm:$0xf0]  ;;  %v2255_v15 = vor.u32 %v2910_v6, %v2252_v7  ;;  %v2936_v7 = vld [vmem:[#allocation4 + $0x144] sm:$0xf] }
  0x85   :  { %v2319_v18 = vor.u32 %v2926_v9, %v2316_v10  ;;  %v2284_v6 = vld [vmem:[#allocation4 + $0xb8] sm:$0xf0]  ;;  %v2952_v9 = vld [vmem:[#allocation4 + $0x1c4] sm:$0xf]  ;;  %v2420_v10 = vld [vmem:[#allocation4 + $0x1c8] sm:$0xf0] }
  0x86   :  { %1472 = vmatpush.bf16.msrb.mxu2 %v2611_v21  ;;  %1485 = vmatpush.bf16.msrb.mxu3 %v2675_v23  ;;  %v2308_v23 = vld [vmem:[#allocation4 + $0xe8] sm:$0xf0] }
  0x88   :  { %1447 = vmatpush.bf16.msrb.mxu0 %v2475_v22  ;;  %1460 = vmatpush.bf16.msrb.mxu1 %v2539_v27  ;;  %v2924_v22 = vld [vmem:[#allocation4 + $0xe4] sm:$0xf]  ;;  %v2958_v27 = vld [vmem:[#allocation4 + $0x1f4] sm:$0xf] }
  0x89   :  { %v2447_v39 = vor.u32 %v2958_v27, %v2444_v28  ;;  %v173_v27 = vperm.slane %v3269_v3, 4  ;;  %v2898_v28 = vld [vmem:[#allocation4 + $0x14] sm:$0xf] }
  0x8a   :  { %1473 = vmatpush.bf16.msrb.mxu2 %v2603_v33  ;;  %1486 = vmatpush.bf16.msrb.mxu3 %v2667_v35  ;;  %v2311_v33 = vor.u32 %v2924_v22, %v2308_v23  ;;  %v2236_v35 = vld [vmem:[#allocation4 + $0x58] sm:$0xf0]  ;;  %v2950_v23 = vld [vmem:[#allocation4 + $0x1b4] sm:$0xf] }
  0x8b   :  { %v2348_v22 = vld [vmem:[#allocation4 + $0x138] sm:$0xf0] }
  0x8c   :  { %1448 = vmatpush.bf16.msrb.mxu0 %v2467_v34  ;;  %1461 = vmatpush.bf16.msrb.mxu1 %v2531_v36  ;;  %v2906_v34 = vld [vmem:[#allocation4 + $0x54] sm:$0xf] }
  0x8e   :  { %1474 = vmatpush.bf16.msrb.mxu2 %v2595_v44  ;;  %1487 = vmatpush.bf16.msrb.mxu3 %v2659_v47  ;;  %v2372_v44 = vld [vmem:[#allocation4 + $0x168] sm:$0xf0]  ;;  %v2239_v47 = vor.u32 %v2906_v34, %v2236_v35  ;;  %v2932_v34 = vld [vmem:[#allocation4 + $0x124] sm:$0xf] }
  0x8f   :  { %v2340_v35 = vld [vmem:[#allocation4 + $0x128] sm:$0xf0] }
  0x90   :  { %1449 = vmatpush.bf16.msrb.mxu0 %v2459_v40  ;;  %1462 = vmatpush.bf16.msrb.mxu1 %v2523_v42  ;;  %v2922_v40 = vld [vmem:[#allocation4 + $0xd4] sm:$0xf]  ;;  %v2940_v42 = vld [vmem:[#allocation4 + $0x164] sm:$0xf] }
  0x91   :  { %v2303_v49 = vor.u32 %v2922_v40, %v2300_v41  ;;  %v2896_v41 = vld [vmem:[#allocation4 + $0x4] sm:$0xf] }
  0x92   :  { %1475 = vmatpush.bf16.msrb.mxu2 %v2587_v57  ;;  %1488 = vmatpush.bf16.msrb.mxu3 %v2651_v60  ;;  %v2428_v60 = vld [vmem:[#allocation4 + $0x1d8] sm:$0xf0] }
  0x94   :  { %1450 = vmatpush.bf16.msrb.mxu0 %v2451_v52  ;;  %1463 = vmatpush.bf16.msrb.mxu1 %v2515_v54  ;;  %v2375_v52 = vor.u32 %v2940_v42, %v2372_v44  ;;  %v2920_v54 = vld [vmem:[#allocation4 + $0xc4] sm:$0xf] }
  0x95   :  { %v2912_v44 = vld [vmem:[#allocation4 + $0x84] sm:$0xf] }
  0x96   :  { %1476 = vmatpush.bf16.msrb.mxu2 %v2579_v63  ;;  %1489 = vmatpush.bf16.msrb.mxu3 %v2643_v2  ;;  %v2295_v63 = vor.u32 %v2920_v54, %v2292_v55  ;;  %v2367_v2 = vor.u32 %v2938_v56, %v2364_v58  ;;  %v2572_v55 = vld [vmem:[#allocation4 + $0x2f8] sm:$0xf0]  ;;  %v2930_v56 = vld [vmem:[#allocation4 + $0x114] sm:$0xf] }
  0xb4   :  { %v514_v8 = vpop.f32.mrf.mxu0  ;;  %v527_v12 = vpop.f32.mrf.mxu1 }
  0xb5   :  { %v515_v11 = vadd.f32 %v514_v8, %v169_v4  ;;  %v528_v13 = vadd.f32 %v527_v12, %v170_v5  ;;  %v2431_v4 = vor.u32 %v2954_v59, %v2428_v60  ;;  %v2918_v5 = vld [vmem:[#allocation4 + $0xb4] sm:$0xf]  ;;  %v2356_v8 = vld [vmem:[#allocation4 + $0x148] sm:$0xf0] }
  0xb6   :  { %v2287_v12 = vor.u32 %v2918_v5, %v2284_v6  ;;  %v2946_v60 = vld [vmem:[#allocation4 + $0x194] sm:$0xf] }
  0xb7   :  { %v3274_v16 = vpack.c.bf16 %v515_v11, %v515_v11  ;;  %v3277_v21 = vpack.c.bf16 %v528_v13, %v528_v13  ;;  %v2223_v11 = vor.u32 %v2902_v0, %v2220_v1  ;;  %v2900_v13 = vld [vmem:[#allocation4 + $0x24] sm:$0xf]  ;;  %v175_v0 = vperm.slane %v3269_v3, 6 }
  0xb8   :  { %v2511_v1 = vor.u32 %v2974_v50, %v2508_v51  ;;  %v2548_v50 = vld [vmem:[#allocation4 + $0x2c8] sm:$0xf0] }
  0xb9   :  { %1399 = vmatmul.bf16.vlgmr.msra.gmra.mxu0 %v3274_v16  ;;  %1412 = vmatmul.bf16.vlgmr.msra.gmra.mxu1 %v3277_v21 }
  0xba   :  { %1495 = vmatpush.bf16.msra.mxu0 %v2255_v15  ;;  %1508 = vmatpush.bf16.msra.mxu1 %v2319_v18  ;;  %v2359_v15 = vor.u32 %v2936_v7, %v2356_v8  ;;  %v2916_v18 = vld [vmem:[#allocation4 + $0xa4] sm:$0xf]  ;;  %v2500_v8 = vld [vmem:[#allocation4 + $0x268] sm:$0xf0] }
  0xbb   :  { %v2279_v26 = vor.u32 %v2916_v18, %v2276_v19  ;;  %v2972_v7 = vld [vmem:[#allocation4 + $0x264] sm:$0xf]  ;;  %v3006_v18 = vld [vmem:[#allocation4 + $0x374] sm:$0xf]  ;;  %v2636_v19 = vld [vmem:[#allocation4 + $0x378] sm:$0xf0] }
  0xbc   :  { %v553_v30 = vpop.f32.mrf.mxu3  ;;  %v516_v37 = vpop.f32.mrf.mxu0 }
  0xbd   :  { %v540_v25 = vpop.f32.mrf.mxu2  ;;  %v554_v32 = vadd.f32 %v553_v30, %v172_v17  ;;  %v529_v43 = vpop.f32.mrf.mxu1  ;;  %v2423_v17 = vor.u32 %v2952_v9, %v2420_v10  ;;  %v2351_v30 = vor.u32 %v2934_v20, %v2348_v22  ;;  %v2948_v37 = vld [vmem:[#allocation4 + $0x1a4] sm:$0xf]  ;;  %v3022_v20 = vld [vmem:[#allocation4 + $0x3f4] sm:$0xf] }
  0xbe   :  { %v541_v29 = vadd.f32 %v540_v25, %v171_v14  ;;  %1496 = vmatpush.bf16.msra.mxu0 %v2247_v31  ;;  %1509 = vmatpush.bf16.msra.mxu1 %v2311_v33  ;;  %v2212_v14 = vld [vmem:[#allocation4 + $0x28] sm:$0xf0]  ;;  %v2415_v31 = vor.u32 %v2950_v23, %v2412_v24  ;;  %v2268_v33 = vld [vmem:[#allocation4 + $0x98] sm:$0xf0]  ;;  %v2988_v10 = vld [vmem:[#allocation4 + $0x2e4] sm:$0xf] }
  0xbf   :  { %v3283_v48 = vpack.c.bf16 %v554_v32, %v554_v32  ;;  %v2215_v25 = vor.u32 %v2900_v13, %v2212_v14  ;;  %v2914_v32 = vld [vmem:[#allocation4 + $0x94] sm:$0xf]  ;;  %v2196_v43 = vld [vmem:[#allocation4 + $0x8] sm:$0xf0]  ;;  %v2944_v14 = vld [vmem:[#allocation4 + $0x184] sm:$0xf] }
  0xc0   :  { %v3281_v36 = vpack.c.bf16 %v541_v29, %v541_v29  ;;  %v2204_v29 = vld [vmem:[#allocation4 + $0x18] sm:$0xf0]  ;;  %v2271_v42 = vor.u32 %v2914_v32, %v2268_v33  ;;  %v2199_v59 = vor.u32 %v2896_v41, %v2196_v43  ;;  %v2324_v13 = vld [vmem:[#allocation4 + $0x108] sm:$0xf0]  ;;  %v2986_v32 = vld [vmem:[#allocation4 + $0x2d4] sm:$0xf] }
  0xc1   :  { %1438 = vmatmul.bf16.vlgmr.msra.gmra.mxu3 %v3283_v48  ;;  %v2207_v40 = vor.u32 %v2898_v28, %v2204_v29  ;;  %v2492_v28 = vld [vmem:[#allocation4 + $0x258] sm:$0xf0]  ;;  %v3004_v41 = vld [vmem:[#allocation4 + $0x364] sm:$0xf] }
  0xc2   :  { %1425 = vmatmul.bf16.vlgmr.msra.gmra.mxu2 %v3281_v36  ;;  %1534 = vmatpush.bf16.msra.mxu3 %v2447_v39  ;;  %v174_v39 = vperm.slane %v3269_v3, 5  ;;  %v2556_v33 = vld [vmem:[#allocation4 + $0x2d8] sm:$0xf0]  ;;  %v3020_v43 = vld [vmem:[#allocation4 + $0x3e4] sm:$0xf] }
  0xc3   :  { %1521 = vmatpush.bf16.msra.mxu2 %v2383_v38  ;;  %1497 = vmatpush.bf16.msra.mxu0 %v2239_v47  ;;  %v2404_v38 = vld [vmem:[#allocation4 + $0x1a8] sm:$0xf0]  ;;  %v2343_v47 = vor.u32 %v2932_v34, %v2340_v35 }
  0xc4   :  { %v555_v61 = vpop.f32.mrf.mxu3  ;;  %1510 = vmatpush.bf16.msra.mxu1 %v2303_v49  ;;  %v2407_v49 = vor.u32 %v2948_v37, %v2404_v38  ;;  %v2639_v37 = vor.u32 %v3006_v18, %v2636_v19  ;;  %v2998_v19 = vld [vmem:[#allocation4 + $0x334] sm:$0xf] }
  0xc5   :  { %v542_v57 = vpop.f32.mrf.mxu2  ;;  %v2396_v61 = vld [vmem:[#allocation4 + $0x198] sm:$0xf0] }
  0xc6   :  { %1535 = vmatpush.bf16.msra.mxu3 %v2439_v53  ;;  %v2332_v57 = vld [vmem:[#allocation4 + $0x118] sm:$0xf0]  ;;  %v2399_v9 = vor.u32 %v2946_v60, %v2396_v61  ;;  %v2966_v61 = vld [vmem:[#allocation4 + $0x234] sm:$0xf] }
  0xc7   :  { %1522 = vmatpush.bf16.msra.mxu2 %v2375_v52  ;;  %1498 = vmatpush.bf16.msra.mxu0 %v2231_v62  ;;  %v2990_v52 = vld [vmem:[#allocation4 + $0x2f4] sm:$0xf]  ;;  %v2335_v6 = vor.u32 %v2930_v56, %v2332_v57  ;;  %v2620_v56 = vld [vmem:[#allocation4 + $0x358] sm:$0xf0] }
  0xc8   :  { %1511 = vmatpush.bf16.msra.mxu1 %v2295_v63  ;;  %v2263_v63 = vor.u32 %v2912_v44, %v2260_v45  ;;  %v2575_v5 = vor.u32 %v2990_v52, %v2572_v55  ;;  %v2559_v44 = vor.u32 %v2986_v32, %v2556_v33  ;;  %v2692_v45 = vld [vmem:[#allocation4 + $0x3e8] sm:$0xf0]  ;;  %v3002_v55 = vld [vmem:[#allocation4 + $0x354] sm:$0xf]  ;;  %v2684_v60 = vld [vmem:[#allocation4 + $0x3d8] sm:$0xf0] }
  0xc9   :  { %v3018_v57 = vld [vmem:[#allocation4 + $0x3d4] sm:$0xf]  ;;  %v3012_v32 = vld [vmem:[#allocation4 + $0x3a4] sm:$0xf] }
  0xca   :  { %1536 = vmatpush.bf16.msra.mxu3 %v2431_v4  ;;  %v176_v4 = vperm.slane %v3269_v3, 7  ;;  %v2503_v3 = vor.u32 %v2972_v7, %v2500_v8  ;;  %v3000_v7 = vld [vmem:[#allocation4 + $0x344] sm:$0xf]  ;;  %v2612_v8 = vld [vmem:[#allocation4 + $0x348] sm:$0xf0] }
  0xcb   :  { %1523 = vmatpush.bf16.msra.mxu2 %v2367_v2  ;;  %1499 = vmatpush.bf16.msra.mxu0 %v2223_v11  ;;  %v2564_v11 = vld [vmem:[#allocation4 + $0x2e8] sm:$0xf0] }
  0xcc   :  { %1512 = vmatpush.bf16.msra.mxu1 %v2287_v12  ;;  %v2928_v12 = vld [vmem:[#allocation4 + $0x104] sm:$0xf] }
  0xce   :  { %1537 = vmatpush.bf16.msra.mxu3 %v2423_v17 }
  0xcf   :  { %1524 = vmatpush.bf16.msra.mxu2 %v2359_v15  ;;  %1500 = vmatpush.bf16.msra.mxu0 %v2215_v25  ;;  %v2388_v15 = vld [vmem:[#allocation4 + $0x188] sm:$0xf0]  ;;  %v2567_v25 = vor.u32 %v2988_v10, %v2564_v11 }
  0xd0   :  { %1513 = vmatpush.bf16.msra.mxu1 %v2279_v26  ;;  %v2700_v26 = vld [vmem:[#allocation4 + $0x3f8] sm:$0xf0]  ;;  %v2391_v35 = vor.u32 %v2944_v14, %v2388_v15  ;;  %v2676_v11 = vld [vmem:[#allocation4 + $0x3c8] sm:$0xf0]  ;;  %v2980_v14 = vld [vmem:[#allocation4 + $0x2a4] sm:$0xf] }
  0xd1   :  { %v2532_v15 = vld [vmem:[#allocation4 + $0x2a8] sm:$0xf0] }
  0xd2   :  { %1538 = vmatpush.bf16.msra.mxu3 %v2415_v31  ;;  %v2327_v31 = vor.u32 %v2928_v12, %v2324_v13  ;;  %v2964_v12 = vld [vmem:[#allocation4 + $0x224] sm:$0xf]  ;;  %v2468_v13 = vld [vmem:[#allocation4 + $0x228] sm:$0xf0] }
  0xd3   :  { %1525 = vmatpush.bf16.msra.mxu2 %v2351_v30  ;;  %1501 = vmatpush.bf16.msra.mxu0 %v2207_v40  ;;  %v2471_v18 = vor.u32 %v2964_v12, %v2468_v13 }
  0xd4   :  { %v566_v46 = vpop.f32.mrf.mxu0  ;;  %v579_v54 = vpop.f32.mrf.mxu1  ;;  %1514 = vmatpush.bf16.msra.mxu1 %v2271_v42  ;;  %v2628_v42 = vld [vmem:[#allocation4 + $0x368] sm:$0xf0] }
  0xd5   :  { %v567_v53 = vadd.f32 %v566_v46, %v173_v27  ;;  %v580_v58 = vadd.f32 %v579_v54, %v174_v39  ;;  %v2970_v27 = vld [vmem:[#allocation4 + $0x254] sm:$0xf]  ;;  %v2703_v39 = vor.u32 %v3022_v20, %v2700_v26  ;;  %v2968_v46 = vld [vmem:[#allocation4 + $0x244] sm:$0xf]  ;;  %v2631_v51 = vor.u32 %v3004_v41, %v2628_v42  ;;  %v2604_v20 = vld [vmem:[#allocation4 + $0x338] sm:$0xf0] }
  0xd6   :  { %1539 = vmatpush.bf16.msra.mxu3 %v2407_v49  ;;  %v2495_v40 = vor.u32 %v2970_v27, %v2492_v28  ;;  %v2984_v49 = vld [vmem:[#allocation4 + $0x2c4] sm:$0xf]  ;;  %v2460_v26 = vld [vmem:[#allocation4 + $0x218] sm:$0xf0]  ;;  %v2978_v27 = vld [vmem:[#allocation4 + $0x294] sm:$0xf]  ;;  %v2607_v28 = vor.u32 %v2998_v19, %v2604_v20 }
  0xd7   :  { %v3289_v62 = vpack.c.bf16 %v567_v53, %v567_v53  ;;  %v3292_v2 = vpack.c.bf16 %v580_v58, %v580_v58  ;;  %1526 = vmatpush.bf16.msra.mxu2 %v2343_v47  ;;  %1502 = vmatpush.bf16.msra.mxu0 %v2199_v59  ;;  %v2484_v47 = vld [vmem:[#allocation4 + $0x248] sm:$0xf0]  ;;  %v2695_v53 = vor.u32 %v3020_v43, %v2692_v45  ;;  %v2994_v45 = vld [vmem:[#allocation4 + $0x314] sm:$0xf]  ;;  %v3035_v20 = vld [vmem:[%s3379_s5 + $0x58] sm:$0xff] }
  0xd8   :  { %1515 = vmatpush.bf16.msra.mxu1 %v2263_v63  ;;  %v2487_v54 = vor.u32 %v2968_v46, %v2484_v47  ;;  %v2551_v59 = vor.u32 %v2984_v49, %v2548_v50  ;;  %v2476_v63 = vld [vmem:[#allocation4 + $0x238] sm:$0xf0]  ;;  %v2516_v41 = vld [vmem:[#allocation4 + $0x288] sm:$0xf0]  ;;  %v3010_v49 = vld [vmem:[#allocation4 + $0x394] sm:$0xf] }
  0xd9   :  { %1451 = vmatmul.bf16.vlgmr.msrb.gmra.mxu0 %v3289_v62  ;;  %1464 = vmatmul.bf16.vlgmr.msrb.gmra.mxu1 %v3292_v2  ;;  %v2588_v46 = vld [vmem:[#allocation4 + $0x318] sm:$0xf0] }
  0xda   :  { %1540 = vmatpush.bf16.msra.mxu3 %v2399_v9  ;;  %v3016_v9 = vld [vmem:[#allocation4 + $0x3c4] sm:$0xf]  ;;  %v2591_v50 = vor.u32 %v2994_v45, %v2588_v46 }
  0xdb   :  { %1547 = vmatpush.bf16.msrb.mxu0 %v2511_v1  ;;  %1527 = vmatpush.bf16.msra.mxu2 %v2335_v6  ;;  %v2540_v1 = vld [vmem:[#allocation4 + $0x2b8] sm:$0xf0]  ;;  %v2479_v6 = vor.u32 %v2966_v61, %v2476_v63 }
  0xdc   :  { %v592_v17 = vpop.f32.mrf.mxu2  ;;  %v605_v23 = vpop.f32.mrf.mxu3  ;;  %1560 = vmatpush.bf16.msrb.mxu1 %v2575_v5  ;;  %v2687_v5 = vor.u32 %v3018_v57, %v2684_v60  ;;  %v3031_v57 = vld [vmem:[%s3379_s5 + $0x38] sm:$0xff]  ;;  %v3026_v60 = vld [vmem:[%s3379_s5 + $0x10] sm:$0xff] }
  0xdd   :  { %v593_v22 = vadd.f32 %v592_v17, %v175_v0  ;;  %v568_v24 = vpop.f32.mrf.mxu0  ;;  %v606_v29 = vadd.f32 %v605_v23, %v176_v4  ;;  %v581_v30 = vpop.f32.mrf.mxu1  ;;  %v2982_v0 = vld [vmem:[#allocation4 + $0x2b4] sm:$0xf]  ;;  %v2623_v4 = vor.u32 %v3002_v55, %v2620_v56  ;;  %v2615_v17 = vor.u32 %v3000_v7, %v2612_v8  ;;  %v3039_v8 = vld [vmem:[%s3379_s5 + $0x78] sm:$0xff] }
  0xde   :  { %1541 = vmatpush.bf16.msra.mxu3 %v2391_v35  ;;  %v2543_v10 = vor.u32 %v2982_v0, %v2540_v1  ;;  %v2535_v23 = vor.u32 %v2980_v14, %v2532_v15  ;;  %v2668_v24 = vld [vmem:[#allocation4 + $0x3b8] sm:$0xf0]  ;;  %v2996_v30 = vld [vmem:[#allocation4 + $0x324] sm:$0xf]  ;;  %v2660_v35 = vld [vmem:[#allocation4 + $0x3a8] sm:$0xf0] }
  0xdf   :  { %v3297_v34 = vpack.c.bf16 %v593_v22, %v593_v22  ;;  %v3299_v38 = vpack.c.bf16 %v606_v29, %v606_v29  ;;  %1548 = vmatpush.bf16.msrb.mxu0 %v2503_v3  ;;  %1528 = vmatpush.bf16.msra.mxu2 %v2327_v31  ;;  %v2679_v3 = vor.u32 %v3016_v9, %v2676_v11  ;;  %v3014_v22 = vld [vmem:[#allocation4 + $0x3b4] sm:$0xf]  ;;  %v2596_v31 = vld [vmem:[#allocation4 + $0x328] sm:$0xf0] }
  0xe0   :  { %1561 = vmatpush.bf16.msrb.mxu1 %v2567_v25  ;;  %v2962_v25 = vld [vmem:[#allocation4 + $0x214] sm:$0xf]  ;;  %v2599_v42 = vor.u32 %v2996_v30, %v2596_v31  ;;  %v2663_v43 = vor.u32 %v3012_v32, %v2660_v35  ;;  %v3025_v1 = vld [vmem:[%s3379_s5 + $0x8] sm:$0xff] }
  0xe1   :  { %1477 = vmatmul.bf16.vlgmr.msrb.gmra.mxu2 %v3297_v34  ;;  %1490 = vmatmul.bf16.vlgmr.msrb.gmra.mxu3 %v3299_v38  ;;  %v2463_v29 = vor.u32 %v2962_v25, %v2460_v26  ;;  %v3038_v11 = vld [vmem:[%s3379_s5 + $0x70] sm:$0xff]  ;;  %v3037_v14 = vld [vmem:[%s3379_s5 + $0x68] sm:$0xff] }
  0xe2   :  { %1586 = vmatpush.bf16.msrb.mxu3 %v2703_v39  ;;  %v2452_v39 = vld [vmem:[#allocation4 + $0x208] sm:$0xf0]  ;;  %v3034_v25 = vld [vmem:[%s3379_s5 + $0x50] sm:$0xff] }
  0xe3   :  { %1573 = vmatpush.bf16.msrb.mxu2 %v2639_v37  ;;  %1549 = vmatpush.bf16.msrb.mxu0 %v2495_v40  ;;  %v2960_v37 = vld [vmem:[#allocation4 + $0x204] sm:$0xf] }
  0xe4   :  { %v594_v52 = vpop.f32.mrf.mxu2  ;;  %v607_v58 = vpop.f32.mrf.mxu3  ;;  %1562 = vmatpush.bf16.msrb.mxu1 %v2559_v44  ;;  %v2976_v40 = vld [vmem:[#allocation4 + $0x284] sm:$0xf]  ;;  %v2455_v44 = vor.u32 %v2960_v37, %v2452_v39 }
  0xe5   :  { %v2519_v47 = vor.u32 %v2976_v40, %v2516_v41  ;;  %v2580_v52 = vld [vmem:[#allocation4 + $0x308] sm:$0xf0] }
  0xe6   :  { %1587 = vmatpush.bf16.msrb.mxu3 %v2695_v53  ;;  %v3008_v53 = vld [vmem:[#allocation4 + $0x384] sm:$0xf] }
  0xe7   :  { %1574 = vmatpush.bf16.msrb.mxu2 %v2631_v51  ;;  %1550 = vmatpush.bf16.msrb.mxu0 %v2487_v54  ;;  %v2644_v54 = vld [vmem:[#allocation4 + $0x388] sm:$0xf0] }
  0xe8   :  { %1563 = vmatpush.bf16.msrb.mxu1 %v2551_v59  ;;  %v2647_v56 = vor.u32 %v3008_v53, %v2644_v54  ;;  %v3027_v59 = vld [vmem:[%s3379_s5 + $0x18] sm:$0xff] }
  0xe9   :  { %1503 = vmatmul.bf16.vlgmr.msra.gmra.mxu0 %v3274_v16  ;;  %1516 = vmatmul.bf16.vlgmr.msra.gmra.mxu1 %v3277_v21  ;;  %v2524_v16 = vld [vmem:[#allocation4 + $0x298] sm:$0xf0]  ;;  %v2671_v21 = vor.u32 %v3014_v22, %v2668_v24 }
  0xea   :  { %1588 = vmatpush.bf16.msrb.mxu3 %v2687_v5  ;;  %v2527_v33 = vor.u32 %v2978_v27, %v2524_v16  ;;  %v745_v5 = vld [vmem:[%s3378_s4] sm:$0x3] }
  0xeb   :  { %1575 = vmatpush.bf16.msrb.mxu2 %v2623_v4  ;;  %1551 = vmatpush.bf16.msrb.mxu0 %v2479_v6  ;;  %v3024_v6 = vld [vmem:[%s3379_s5] sm:$0xff]  ;;  %v747_v7 = vperm.slane %v745_v5, 0  ;;  %v748_v40 = vperm.slane %v745_v5, 1 }
  0xec   :  { %1564 = vmatpush.bf16.msrb.mxu1 %v2543_v10 }
  0xee   :  { %1589 = vmatpush.bf16.msrb.mxu3 %v2679_v3 }
  0xef   :  { %1576 = vmatpush.bf16.msrb.mxu2 %v2615_v17  ;;  %1552 = vmatpush.bf16.msrb.mxu0 %v2471_v18  ;;  %v3036_v18 = vld [vmem:[%s3379_s5 + $0x60] sm:$0xff] }
  0xf0   :  { %1565 = vmatpush.bf16.msrb.mxu1 %v2535_v23 }
  0xf1   :  { %1529 = vmatmul.bf16.vlgmr.msra.gmra.mxu2 %v3281_v36  ;;  %1542 = vmatmul.bf16.vlgmr.msra.gmra.mxu3 %v3283_v48  ;;  %v2652_v36 = vld [vmem:[#allocation4 + $0x398] sm:$0xf0]  ;;  %v2992_v48 = vld [vmem:[#allocation4 + $0x304] sm:$0xf] }
  0xf2   :  { %1590 = vmatpush.bf16.msrb.mxu3 %v2671_v21  ;;  %v2655_v51 = vor.u32 %v3010_v49, %v2652_v36  ;;  %v2583_v55 = vor.u32 %v2992_v48, %v2580_v52  ;;  %v3033_v21 = vld [vmem:[%s3379_s5 + $0x48] sm:$0xff] }
  0xf3   :  { %1577 = vmatpush.bf16.msrb.mxu2 %v2607_v28  ;;  %1553 = vmatpush.bf16.msrb.mxu0 %v2463_v29 }
  0xf4   :  { %1566 = vmatpush.bf16.msrb.mxu1 %v2527_v33  ;;  %v3032_v33 = vld [vmem:[%s3379_s5 + $0x40] sm:$0xff] }
  0xf6   :  { %1591 = vmatpush.bf16.msrb.mxu3 %v2663_v43 }
  0xf7   :  { %1578 = vmatpush.bf16.msrb.mxu2 %v2599_v42  ;;  %1554 = vmatpush.bf16.msrb.mxu0 %v2455_v44 }
  0xf8   :  { %1567 = vmatpush.bf16.msrb.mxu1 %v2519_v47 }
  0xfa   :  { %1555 = vmatmul.bf16.vlgmr.msrb.gmra.mxu0 %v3289_v62  ;;  %1592 = vmatpush.bf16.msrb.mxu3 %v2655_v51  ;;  %v3030_v62 = vld [vmem:[%s3379_s5 + $0x30] sm:$0xff] }
  0xfb   :  { %1579 = vmatpush.bf16.msrb.mxu2 %v2591_v50  ;;  %1568 = vmatmul.bf16.vlgmr.msrb.gmra.mxu1 %v3292_v2  ;;  %v3029_v2 = vld [vmem:[%s3379_s5 + $0x28] sm:$0xff] }
  0xfc   :  { %1735 = vmatpush.bf16.msra.mxu0 %v3031_v57  ;;  %1748 = vmatpush.bf16.msra.mxu1 %v3039_v8 }
  0xfe   :  { %1593 = vmatpush.bf16.msrb.mxu3 %v2647_v56 }
  0xff   :  { %1580 = vmatpush.bf16.msrb.mxu2 %v2583_v55 }
 0x100   :  { %1736 = vmatpush.bf16.msra.mxu0 %v3030_v62  ;;  %1749 = vmatpush.bf16.msra.mxu1 %v3038_v11  ;;  %v3053_v11 = vld [vmem:[#allocation7 + $0x28] sm:$0xff] }
 0x101   :  { %1594 = vmatmul.bf16.vlgmr.msrb.gmra.mxu3 %v3299_v38 }
 0x102   :  { %1581 = vmatmul.bf16.vlgmr.msrb.gmra.mxu2 %v3297_v34  ;;  %v3028_v34 = vld [vmem:[%s3379_s5 + $0x20] sm:$0xff] }
 0x104   :  { %1737 = vmatpush.bf16.msra.mxu0 %v3029_v2  ;;  %1750 = vmatpush.bf16.msra.mxu1 %v3037_v14  ;;  %v3050_v14 = vld [vmem:[#allocation7 + $0x10] sm:$0xff] }
 0x108   :  { %1738 = vmatpush.bf16.msra.mxu0 %v3028_v34  ;;  %1751 = vmatpush.bf16.msra.mxu1 %v3036_v18 }
 0x10c   :  { %1739 = vmatpush.bf16.msra.mxu0 %v3027_v59  ;;  %1752 = vmatpush.bf16.msra.mxu1 %v3035_v20 }
 0x110   :  { %1740 = vmatpush.bf16.msra.mxu0 %v3026_v60  ;;  %1753 = vmatpush.bf16.msra.mxu1 %v3034_v25  ;;  %v3047_v60 = vld [vmem:[#allocation6 + $0x38] sm:$0xff]  ;;  %v3067_v25 = vld [vmem:[%s3382_s8] ss:$0 sm:$0xff] }
 0x111   :  { %1831 = vmatpush.bf16.msra.mxu2 %v3047_v60 }
 0x114   :  { %1741 = vmatpush.bf16.msra.mxu0 %v3025_v1  ;;  %1754 = vmatpush.bf16.msra.mxu1 %v3033_v21  ;;  %v3043_v1 = vld [vmem:[#allocation6 + $0x18] sm:$0xff] }
 0x118   :  { %1742 = vmatpush.bf16.msra.mxu0 %v3024_v6  ;;  %1755 = vmatpush.bf16.msra.mxu1 %v3032_v33  ;;  %v3041_v6 = vld [vmem:[#allocation6 + $0x8] sm:$0xff] }
 0x136   :  { %v1400_v38 = vpop.f32.mrf.mxu0  ;;  %v1413_v58 = vpop.f32.mrf.mxu1 }
 0x137   :  { %v1401_v12 = vadd.f32 %v1400_v38, %v747_v7  ;;  %v3040_v7 = vld [vmem:[#allocation6] sm:$0xff] }
 0x139   :  { %v1414_v13 = vadd.f32 %v1413_v58, %v1401_v12  ;;  %v3052_v12 = vld [vmem:[#allocation7 + $0x20] sm:$0xff] }
 0x13e   :  { %v1402_v61 = vpop.f32.mrf.mxu0  ;;  %v1415_v63 = vpop.f32.mrf.mxu1 }
 0x13f   :  { %v3046_v61 = vld [vmem:[#allocation6 + $0x30] sm:$0xff]  ;;  %v3045_v63 = vld [vmem:[#allocation6 + $0x28] sm:$0xff] }
 0x140   :  { %1832 = vmatpush.bf16.msra.mxu2 %v3046_v61 }
 0x144   :  { %v1439_v4 = vpop.f32.mrf.mxu3  ;;  %1833 = vmatpush.bf16.msra.mxu2 %v3045_v63 }
 0x145   :  { %v1426_v0 = vpop.f32.mrf.mxu2 }
 0x146   :  { %v1427_v3 = vadd.f32 %v1426_v0, %v1414_v13  ;;  %v3044_v0 = vld [vmem:[#allocation6 + $0x20] sm:$0xff]  ;;  %v3051_v13 = vld [vmem:[#allocation7 + $0x18] sm:$0xff] }
 0x148   :  { %v1440_v19 = vadd.f32 %v1439_v4, %v1427_v3  ;;  %1834 = vmatpush.bf16.msra.mxu2 %v3044_v0  ;;  %v3042_v4 = vld [vmem:[#allocation6 + $0x10] sm:$0xff] }
 0x14c   :  { %v1441_v10 = vpop.f32.mrf.mxu3  ;;  %1835 = vmatpush.bf16.msra.mxu2 %v3043_v1 }
 0x14d   :  { %v1428_v9 = vpop.f32.mrf.mxu2  ;;  %v3054_v10 = vld [vmem:[#allocation7 + $0x30] sm:$0xff] }
 0x14e   :  { %v3055_v9 = vld [vmem:[#allocation7 + $0x38] sm:$0xff] }
 0x14f   :  { %1914 = vmatpush.bf16.msra.mxu3 %v3055_v9 }
 0x150   :  { %1836 = vmatpush.bf16.msra.mxu2 %v3042_v4 }
 0x153   :  { %1915 = vmatpush.bf16.msra.mxu3 %v3054_v10 }
 0x154   :  { %1837 = vmatpush.bf16.msra.mxu2 %v3041_v6 }
 0x156   :  { %v1452_v15 = vpop.f32.mrf.mxu0  ;;  %v1465_v17 = vpop.f32.mrf.mxu1 }
 0x157   :  { %v1453_v22 = vadd.f32 %v1452_v15, %v1440_v19  ;;  %1916 = vmatpush.bf16.msra.mxu3 %v3053_v11  ;;  %v3066_v15 = vld [vmem:[%s3380_s6] ss:$0 sm:$0xff] }
 0x158   :  { %1838 = vmatpush.bf16.msra.mxu2 %v3040_v7 }
 0x159   :  { %v1466_v26 = vadd.f32 %v1465_v17, %v1453_v22 }
 0x15b   :  { %1917 = vmatpush.bf16.msra.mxu3 %v3052_v12 }
 0x15e   :  { %v1454_v23 = vpop.f32.mrf.mxu0  ;;  %v1467_v24 = vpop.f32.mrf.mxu1 }
 0x15f   :  { %1918 = vmatpush.bf16.msra.mxu3 %v3051_v13  ;;  %v3049_v23 = vld [vmem:[#allocation7 + $0x8] sm:$0xff]  ;;  %v3048_v24 = vld [vmem:[#allocation7] sm:$0xff] }
 0x163   :  { %1919 = vmatpush.bf16.msra.mxu3 %v3050_v14 }
 0x164   :  { %v1478_v27 = vpop.f32.mrf.mxu2  ;;  %v1491_v28 = vpop.f32.mrf.mxu3 }
 0x165   :  { %v1479_v16 = vadd.f32 %v1478_v27, %v1466_v26 }
 0x166   :  { %v1504_v30 = vpop.f32.mrf.mxu0  ;;  %v1517_v31 = vpop.f32.mrf.mxu1 }
 0x167   :  { %v1492_v29 = vadd.f32 %v1491_v28, %v1479_v16  ;;  %v1505_v43 = vadd.f32 %v1504_v30, %v748_v40  ;;  %1920 = vmatpush.bf16.msra.mxu3 %v3049_v23 }
 0x169   :  { %v1599_v32 = vmax.f32 %v1492_v29, 0.0  ;;  %v1518_v46 = vadd.f32 %v1517_v31, %v1505_v43  ;;  %v3068_v29 = vld [vmem:[%s3384_s10] ss:$0 sm:$0xff] }
 0x16b   :  { %v1601_v35 = vpack.c.bf16 %v1599_v32, %v1599_v32  ;;  %1921 = vmatpush.bf16.msra.mxu3 %v3048_v24 }
 0x16c   :  { %v1480_v37 = vpop.f32.mrf.mxu2  ;;  %v1493_v39 = vpop.f32.mrf.mxu3 }
 0x16d   :  { %1743 = vmatmul.bf16.vlgmr.msra.gmra.mxu0 %v1601_v35 }
 0x16e   :  { %v1506_v41 = vpop.f32.mrf.mxu0  ;;  %v1519_v42 = vpop.f32.mrf.mxu1 }
 0x174   :  { %v1530_v44 = vpop.f32.mrf.mxu2  ;;  %v1543_v45 = vpop.f32.mrf.mxu3 }
 0x175   :  { %v1531_v47 = vadd.f32 %v1530_v44, %v1518_v46 }
 0x177   :  { %v1556_v49 = vpop.f32.mrf.mxu0  ;;  %v1544_v50 = vadd.f32 %v1543_v45, %v1531_v47 }
 0x178   :  { %v1569_v36 = vpop.f32.mrf.mxu1 }
 0x179   :  { %v1557_v52 = vadd.f32 %v1556_v49, %v1544_v50 }
 0x17b   :  { %v1570_v55 = vadd.f32 %v1569_v36, %v1557_v52 }
 0x17c   :  { %v1532_v51 = vpop.f32.mrf.mxu2  ;;  %v1545_v48 = vpop.f32.mrf.mxu3 }
 0x17f   :  { %v1558_v53 = vpop.f32.mrf.mxu0 }
 0x180   :  { %v1571_v54 = vpop.f32.mrf.mxu1 }
 0x184   :  { %v1595_v62 = vpop.f32.mrf.mxu3 }
 0x185   :  { %v1582_v56 = vpop.f32.mrf.mxu2 }
 0x186   :  { %v1583_v57 = vadd.f32 %v1582_v56, %v1570_v55 }
 0x188   :  { %v1596_v2 = vadd.f32 %v1595_v62, %v1583_v57 }
 0x18a   :  { %v1600_v34 = vmax.f32 %v1596_v2, 0.0 }
 0x18c   :  { %v1602_v38 = vpack.c.bf16 %v1600_v34, %v1600_v34  ;;  %v1597_v59 = vpop.f32.mrf.mxu3 }
 0x18d   :  { %v1584_v58 = vpop.f32.mrf.mxu2 }
 0x18e   :  { %1756 = vmatmul.bf16.vlgmr.msra.gmra.mxu1 %v1602_v38 }
 0x1ea   :  { %v1744_v5 = vpop.f32.mrf.mxu0 }
 0x1eb   :  { %v1745_v17 = vadd.f32 %v3066_v15, %v1744_v5 }
 0x1f2   :  { %v1746_v8 = vpop.f32.mrf.mxu0 }
 0x20b   :  { %v1757_v3 = vpop.f32.mrf.mxu1 }
 0x20c   :  { %v1758_v18 = vadd.f32 %v1757_v3, %v1745_v17 }
 0x20e   :  { %v1761_v19 = vmax.f32 %v1758_v18, 0.0 }
 0x210   :  { %v1762_v20 = vpack.c.bf16 %v1761_v19, %v1761_v19 }
 0x212   :  { %1839 = vmatmul.bf16.vlgmr.msra.gmra.mxu2 %v1762_v20 }
 0x213   :  { %v1759_v22 = vpop.f32.mrf.mxu1 }
 0x295   :  { %v1840_v26 = vpop.f32.mrf.mxu2 }
 0x296   :  { %v1841_v27 = vadd.f32 %v3067_v25, %v1840_v26 }
 0x298   :  { %v1844_v16 = vmax.f32 %v1841_v27, 0.0 }
 0x29a   :  { %v1845_v28 = vpack.c.bf16 %v1844_v16, %v1844_v16 }
 0x29c   :  { %1922 = vmatmul.bf16.vlgmr.msra.gmra.mxu3 %v1845_v28 }
 0x29d   :  { %v1842_v21 = vpop.f32.mrf.mxu2 }
 0x31f   :  { %v1923_v30 = vpop.f32.mrf.mxu3 }
 0x320   :  { %v1924_v31 = vadd.f32 %v3068_v29, %v1923_v30 }
 0x322   :  { %v1927_v32 = vmax.f32 %v1924_v31, 0.0 }
 0x324   :  { %1928 = vst [vmem:[%s3385_s11] sm:$0xff] %v1927_v32 }
 0x327   :  { %v1925_v33 = vpop.f32.mrf.mxu3 }
 0x328   :  { %1933 = vsyncpa [#allocation3], 1 }
 0x329   :  { %1934 = vsyncpa [#allocation5], 1 }
 0x32a   :  { %1935 = vsyncpa [#allocation8], 1 }

</bundles_post_ra>
